<compile_context>
chip_gen: v5e
topology: v5e:2x2
jax: 0.10.0
libtpu: 0.0.40
codegen_flags: <defaults>
</compile_context>

<pallas_src>
import jax
import jax.numpy as jnp
from jax.experimental import pallas as pl
from jax.experimental.pallas import tpu as pltpu

CHANNELS = (32, 64, 128, 256)


def _encoder_kernel(const_ref, x_ref, *refs):
    """Fused per-pixel MLP + sigmoid + const scale.

    Layout: activations are [C, tile_m] (channels on sublane, pixels on lane).
    refs = (w0, b0, w1, b1, ..., w_last, b_last, o_ref)
      w_l    : [C_out, C_in]  bf16 for all MXU layers
      w_last : [C_last, 1]    f32  (final layer runs on VPU/XLU, not MXU)
      b_l    : [C_out, 1]     f32
    """
    o_ref = refs[-1]
    wb = refs[:-1]
    n_layers = len(wb) // 2

    h = x_ref[...].astype(jnp.float32)                 # [C_in, tile_m]

    # All but the last layer: bf16 MXU matmul with f32 accumulation + ReLU.
    for l in range(n_layers - 1):
        w = wb[2 * l][...]                             # [C_out, C_in] bf16
        b = wb[2 * l + 1][...]                         # [C_out, 1]    f32
        h = jnp.dot(w, h.astype(jnp.bfloat16),
                    preferred_element_type=jnp.float32) + b
        h = jnp.maximum(h, 0.0)                        # ReLU between layers

    # Final C_last -> 1 layer off the MXU: VPU multiply + XLU sublane reduce.
    w_last = wb[-2][...]                               # [C_last, 1] f32
    b_last = wb[-1][...]                               # [1, 1]      f32
    logits = jnp.sum(h * w_last, axis=0, keepdims=True) + b_last   # [1, tile_m]

    # sigmoid = 1 / (1 + exp(-x)); exp and approx reciprocal both go to EUP.
    y = pl.reciprocal(1.0 + jnp.exp(-logits), approx=True)
    o_ref[...] = (y * const_ref[0]).astype(o_ref.dtype)


def init_encoder_params(key, input_dim, encoder_depth=4):
    """Deterministic synthetic parameters, weights stored as [C_out, C_in]."""
    chans = [input_dim] + list(CHANNELS[:encoder_depth]) + [1]
    params = []
    for i in range(len(chans) - 1):
        key, kw, kb = jax.random.split(key, 3)
        fan_in = chans[i]
        w = jax.random.normal(kw, (chans[i + 1], chans[i]), jnp.float32)
        w = w * (1.0 / jnp.sqrt(jnp.float32(fan_in)))
        b = 0.01 * jax.random.normal(kb, (chans[i + 1], 1), jnp.float32)
        params.append((w, b))
    return params


def encoder_forward(x_nchw, params, const, *, tile_m=512):
    """Pallas-backed forward: sigmoid(encoder(x)) * const. Input/Output NCHW."""
    N, C, H, W = x_nchw.shape
    HW = H * W
    tile_m = min(tile_m, HW)
    assert HW % tile_m == 0, "H*W must be divisible by tile_m"

    # No transpose: NCHW -> (N, C, H*W) is a free contiguous reshape.
    x3d = x_nchw.reshape(N, C, HW).astype(jnp.float32)

    const_val = 1.0 if const is None else const
    const_arr = jnp.asarray([const_val], jnp.float32)

    # Pre-cast MXU-layer weights to bf16 (f32 accumulation inside the kernel
    # keeps precision); the final (C_last -> 1) weight stays f32 and is passed
    # transposed as a [C_last, 1] column for the VPU/XLU reduction.
    kparams = []
    for l, (w, b) in enumerate(params):
        if l < len(params) - 1:
            kparams.append((w.astype(jnp.bfloat16), b.astype(jnp.float32)))
        else:
            kparams.append((jnp.transpose(w).astype(jnp.float32),
                            b.astype(jnp.float32)))

    flat_params = []
    in_specs = [
        pl.BlockSpec(memory_space=pltpu.MemorySpace.SMEM),        # const scalar
        pl.BlockSpec((None, C, tile_m), lambda n, i: (n, 0, i)),  # x tile [C, tile_m]
    ]
    for (w, b) in kparams:
        flat_params += [w, b]
        in_specs += [
            pl.BlockSpec(w.shape, lambda n, i: (0, 0)),           # full weight
            pl.BlockSpec(b.shape, lambda n, i: (0, 0)),           # full bias
        ]

    out3d = pl.pallas_call(
        _encoder_kernel,
        out_shape=jax.ShapeDtypeStruct((N, 1, HW), jnp.float32),
        grid_spec=pl.GridSpec(
            grid=(N, HW // tile_m),
            in_specs=in_specs,
            out_specs=pl.BlockSpec((None, 1, tile_m), lambda n, i: (n, 0, i)),
        ),
        compiler_params=pltpu.CompilerParams(
            dimension_semantics=("parallel", "parallel")),
    )(const_arr, x3d, *flat_params)

    # (N, 1, H*W) -> (N, 1, H, W): free contiguous reshape, no transpose.
    return out3d.reshape(N, 1, H, W)


def encoder_forward_ref(x_nchw, params, const):
    """Pure-JAX f32 reference for verification."""
    N, C, H, W = x_nchw.shape
    const_val = 1.0 if const is None else const
    h = x_nchw.reshape(N, C, H * W).astype(jnp.float32)        # [N, C, HW]
    for l, (w, b) in enumerate(params):
        h = jnp.einsum('oc,ncm->nom', w, h) + b[None]          # [N, C_out, HW]
        if l < len(params) - 1:
            h = jnp.maximum(h, 0.0)
    y = jax.nn.sigmoid(h) * const_val
    return y.reshape(N, 1, H, W)


if __name__ == "__main__":
    key = jax.random.PRNGKey(0)
    k_x, k_p = jax.random.split(key)

    N, C, H, W = 2, 4, 16, 16          # input_dim = 4
    encoder_depth = 4
    const = 2.5                         # exercises the nn.Parameter(const) path

    x = jax.random.normal(k_x, (N, C, H, W), jnp.float32)
    params = init_encoder_params(k_p, C, encoder_depth)

    out = encoder_forward(x, params, const)
    out = jax.block_until_ready(out)

    ref = encoder_forward_ref(x, params, const)
    assert out.shape == (N, 1, H, W)
    # bf16 MXU matmuls + approx reciprocal => loosened tolerance vs f32 ref.
    assert jnp.allclose(out, ref, atol=5e-2, rtol=5e-2), "mismatch vs reference"

    print("KERNEL_OK")
</pallas_src>

<mosaic_0001>
module attributes {stable_mosaic.version = 11 : i64} {
  func.func @_encoder_kernel(%arg0: i32, %arg1: i32, %arg2: memref<1xf32, #tpu.memory_space<smem>>, %arg3: memref<1x4x256xf32, #tpu.memory_space<vmem>>, %arg4: memref<32x4xbf16, #tpu.memory_space<vmem>>, %arg5: memref<32x1xf32, #tpu.memory_space<vmem>>, %arg6: memref<64x32xbf16, #tpu.memory_space<vmem>>, %arg7: memref<64x1xf32, #tpu.memory_space<vmem>>, %arg8: memref<128x64xbf16, #tpu.memory_space<vmem>>, %arg9: memref<128x1xf32, #tpu.memory_space<vmem>>, %arg10: memref<256x128xbf16, #tpu.memory_space<vmem>>, %arg11: memref<256x1xf32, #tpu.memory_space<vmem>>, %arg12: memref<256x1xf32, #tpu.memory_space<vmem>>, %arg13: memref<1x1xf32, #tpu.memory_space<vmem>>, %arg14: memref<1x1x256xf32, #tpu.memory_space<vmem>>) attributes {dimension_semantics = [#tpu.dimension_semantics<parallel>, #tpu.dimension_semantics<parallel>], iteration_bounds = array<i64: 2, 1>, scalar_prefetch = 0 : i64, scratch_operands = 0 : i64, tpu.core_type = #tpu.core_type<tc>, window_params = [{transform_indices = @transform_0, window_bounds = array<i64: 1>}, {transform_indices = @transform_1, window_bounds = array<i64: 1, 4, 256>}, {pipeline_mode = #tpu.pipeline_mode<synchronous>, transform_indices = @transform_2, window_bounds = array<i64: 32, 4>}, {pipeline_mode = #tpu.pipeline_mode<synchronous>, transform_indices = @transform_3, window_bounds = array<i64: 32, 1>}, {pipeline_mode = #tpu.pipeline_mode<synchronous>, transform_indices = @transform_4, window_bounds = array<i64: 64, 32>}, {pipeline_mode = #tpu.pipeline_mode<synchronous>, transform_indices = @transform_5, window_bounds = array<i64: 64, 1>}, {pipeline_mode = #tpu.pipeline_mode<synchronous>, transform_indices = @transform_6, window_bounds = array<i64: 128, 64>}, {pipeline_mode = #tpu.pipeline_mode<synchronous>, transform_indices = @transform_7, window_bounds = array<i64: 128, 1>}, {pipeline_mode = #tpu.pipeline_mode<synchronous>, transform_indices = @transform_8, window_bounds = array<i64: 256, 128>}, {pipeline_mode = #tpu.pipeline_mode<synchronous>, transform_indices = @transform_9, window_bounds = array<i64: 256, 1>}, {pipeline_mode = #tpu.pipeline_mode<synchronous>, transform_indices = @transform_10, window_bounds = array<i64: 256, 1>}, {pipeline_mode = #tpu.pipeline_mode<synchronous>, transform_indices = @transform_11, window_bounds = array<i64: 1, 1>}, {transform_indices = @transform_12, window_bounds = array<i64: 1, 1, 256>}]} {
    %c0 = arith.constant 0 : index
    %c0_0 = arith.constant 0 : index
    %c0_1 = arith.constant 0 : index
    %0 = vector.load %arg3[%c0, %c0_0, %c0_1] : memref<1x4x256xf32, #tpu.memory_space<vmem>>, vector<1x4x256xf32>
    %1 = vector.shape_cast %0 : vector<1x4x256xf32> to vector<4x256xf32>
    %c0_2 = arith.constant 0 : index
    %c0_3 = arith.constant 0 : index
    %2 = vector.load %arg4[%c0_2, %c0_3] : memref<32x4xbf16, #tpu.memory_space<vmem>>, vector<32x4xbf16>
    %c0_4 = arith.constant 0 : index
    %c0_5 = arith.constant 0 : index
    %3 = vector.load %arg5[%c0_4, %c0_5] : memref<32x1xf32, #tpu.memory_space<vmem>>, vector<32x1xf32>
    %4 = arith.truncf %1 : vector<4x256xf32> to vector<4x256xbf16>
    %cst = arith.constant dense<0.000000e+00> : vector<32x256xf32>
    %5 = tpu.matmul %2, %4, %cst {dimension_numbers = #tpu.dot_dimension_numbers<[1], [0], [0], [1], [0, 0, 1, 1], [], []>} : vector<32x4xbf16>, vector<4x256xbf16>, vector<32x256xf32> -> vector<32x256xf32>
    %6 = vector.broadcast %3 : vector<32x1xf32> to vector<32x256xf32>
    %7 = arith.addf %5, %6 : vector<32x256xf32>
    %cst_6 = arith.constant 0.000000e+00 : f32
    %8 = vector.broadcast %cst_6 : f32 to vector<32x256xf32>
    %9 = arith.maximumf %7, %8 : vector<32x256xf32>
    %c0_7 = arith.constant 0 : index
    %c0_8 = arith.constant 0 : index
    %10 = vector.load %arg6[%c0_7, %c0_8] : memref<64x32xbf16, #tpu.memory_space<vmem>>, vector<64x32xbf16>
    %c0_9 = arith.constant 0 : index
    %c0_10 = arith.constant 0 : index
    %11 = vector.load %arg7[%c0_9, %c0_10] : memref<64x1xf32, #tpu.memory_space<vmem>>, vector<64x1xf32>
    %12 = arith.truncf %9 : vector<32x256xf32> to vector<32x256xbf16>
    %cst_11 = arith.constant dense<0.000000e+00> : vector<64x256xf32>
    %13 = tpu.matmul %10, %12, %cst_11 {dimension_numbers = #tpu.dot_dimension_numbers<[1], [0], [0], [1], [0, 0, 1, 1], [], []>} : vector<64x32xbf16>, vector<32x256xbf16>, vector<64x256xf32> -> vector<64x256xf32>
    %14 = vector.broadcast %11 : vector<64x1xf32> to vector<64x256xf32>
    %15 = arith.addf %13, %14 : vector<64x256xf32>
    %cst_12 = arith.constant 0.000000e+00 : f32
    %16 = vector.broadcast %cst_12 : f32 to vector<64x256xf32>
    %17 = arith.maximumf %15, %16 : vector<64x256xf32>
    %c0_13 = arith.constant 0 : index
    %c0_14 = arith.constant 0 : index
    %18 = vector.load %arg8[%c0_13, %c0_14] : memref<128x64xbf16, #tpu.memory_space<vmem>>, vector<128x64xbf16>
    %c0_15 = arith.constant 0 : index
    %c0_16 = arith.constant 0 : index
    %19 = vector.load %arg9[%c0_15, %c0_16] : memref<128x1xf32, #tpu.memory_space<vmem>>, vector<128x1xf32>
    %20 = arith.truncf %17 : vector<64x256xf32> to vector<64x256xbf16>
    %cst_17 = arith.constant dense<0.000000e+00> : vector<128x256xf32>
    %21 = tpu.matmul %18, %20, %cst_17 {dimension_numbers = #tpu.dot_dimension_numbers<[1], [0], [0], [1], [0, 0, 1, 1], [], []>} : vector<128x64xbf16>, vector<64x256xbf16>, vector<128x256xf32> -> vector<128x256xf32>
    %22 = vector.broadcast %19 : vector<128x1xf32> to vector<128x256xf32>
    %23 = arith.addf %21, %22 : vector<128x256xf32>
    %cst_18 = arith.constant 0.000000e+00 : f32
    %24 = vector.broadcast %cst_18 : f32 to vector<128x256xf32>
    %25 = arith.maximumf %23, %24 : vector<128x256xf32>
    %c0_19 = arith.constant 0 : index
    %c0_20 = arith.constant 0 : index
    %26 = vector.load %arg10[%c0_19, %c0_20] : memref<256x128xbf16, #tpu.memory_space<vmem>>, vector<256x128xbf16>
    %c0_21 = arith.constant 0 : index
    %c0_22 = arith.constant 0 : index
    %27 = vector.load %arg11[%c0_21, %c0_22] : memref<256x1xf32, #tpu.memory_space<vmem>>, vector<256x1xf32>
    %28 = arith.truncf %25 : vector<128x256xf32> to vector<128x256xbf16>
    %cst_23 = arith.constant dense<0.000000e+00> : vector<256x256xf32>
    %29 = tpu.matmul %26, %28, %cst_23 {dimension_numbers = #tpu.dot_dimension_numbers<[1], [0], [0], [1], [0, 0, 1, 1], [], []>} : vector<256x128xbf16>, vector<128x256xbf16>, vector<256x256xf32> -> vector<256x256xf32>
    %30 = vector.broadcast %27 : vector<256x1xf32> to vector<256x256xf32>
    %31 = arith.addf %29, %30 : vector<256x256xf32>
    %cst_24 = arith.constant 0.000000e+00 : f32
    %32 = vector.broadcast %cst_24 : f32 to vector<256x256xf32>
    %33 = arith.maximumf %31, %32 : vector<256x256xf32>
    %c0_25 = arith.constant 0 : index
    %c0_26 = arith.constant 0 : index
    %34 = vector.load %arg12[%c0_25, %c0_26] : memref<256x1xf32, #tpu.memory_space<vmem>>, vector<256x1xf32>
    %c0_27 = arith.constant 0 : index
    %c0_28 = arith.constant 0 : index
    %35 = vector.load %arg13[%c0_27, %c0_28] : memref<1x1xf32, #tpu.memory_space<vmem>>, vector<1x1xf32>
    %36 = vector.broadcast %34 : vector<256x1xf32> to vector<256x256xf32>
    %37 = arith.mulf %33, %36 : vector<256x256xf32>
    %cst_29 = arith.constant dense<0.000000e+00> : vector<256xf32>
    %38 = vector.multi_reduction <add>, %37, %cst_29 [0] : vector<256x256xf32> to vector<256xf32>
    %39 = vector.shape_cast %38 : vector<256xf32> to vector<1x256xf32>
    %40 = vector.broadcast %35 : vector<1x1xf32> to vector<1x256xf32>
    %41 = arith.addf %39, %40 : vector<1x256xf32>
    %cst_30 = arith.constant 0.000000e+00 : f32
    %42 = vector.broadcast %cst_30 : f32 to vector<1x256xf32>
    %43 = arith.subf %42, %41 : vector<1x256xf32>
    %44 = math.exp %43 : vector<1x256xf32>
    %cst_31 = arith.constant 1.000000e+00 : f32
    %45 = vector.broadcast %cst_31 : f32 to vector<1x256xf32>
    %46 = arith.addf %45, %44 : vector<1x256xf32>
    %47 = tpu.reciprocal %46 {approx = true} : vector<1x256xf32> -> vector<1x256xf32>
    %c0_32 = arith.constant 0 : index
    %48 = memref.load %arg2[%c0_32] : memref<1xf32, #tpu.memory_space<smem>>
    %49 = vector.broadcast %48 : f32 to vector<1x256xf32>
    %50 = arith.mulf %47, %49 : vector<1x256xf32>
    %c0_33 = arith.constant 0 : index
    %c0_34 = arith.constant 0 : index
    %c0_35 = arith.constant 0 : index
    %51 = vector.load %arg14[%c0_33, %c0_34, %c0_35] : memref<1x1x256xf32, #tpu.memory_space<vmem>>, vector<1x1x256xf32>
    %52 = vector.shape_cast %51 : vector<1x1x256xf32> to vector<1x256xf32>
    %53 = vector.shape_cast %50 : vector<1x256xf32> to vector<1x1x256xf32>
    tpu.vector_store %arg14[%c0_33, %c0_34, %c0_35], %53 {strides = array<i32>} : memref<1x1x256xf32, #tpu.memory_space<vmem>>, vector<1x1x256xf32>,
    return
  }
  func.func @transform_0(%arg0: i32, %arg1: i32) -> i32 {
    %c0_i32 = arith.constant 0 : i32
    %c0_i32_0 = arith.constant 0 : i32
    return %c0_i32 : i32
  }
  func.func @transform_1(%arg0: i32, %arg1: i32) -> (i32, i32, i32) {
    %c0_i32 = arith.constant 0 : i32
    %c0_i32_0 = arith.constant 0 : i32
    return %arg0, %c0_i32, %arg1 : i32, i32, i32
  }
  func.func @transform_2(%arg0: i32, %arg1: i32) -> (i32, i32) {
    %c0_i32 = arith.constant 0 : i32
    %c0_i32_0 = arith.constant 0 : i32
    %c0_i32_1 = arith.constant 0 : i32
    return %c0_i32, %c0_i32_0 : i32, i32
  }
  func.func @transform_3(%arg0: i32, %arg1: i32) -> (i32, i32) {
    %c0_i32 = arith.constant 0 : i32
    %c0_i32_0 = arith.constant 0 : i32
    %c0_i32_1 = arith.constant 0 : i32
    return %c0_i32, %c0_i32_0 : i32, i32
  }
  func.func @transform_4(%arg0: i32, %arg1: i32) -> (i32, i32) {
    %c0_i32 = arith.constant 0 : i32
    %c0_i32_0 = arith.constant 0 : i32
    %c0_i32_1 = arith.constant 0 : i32
    return %c0_i32, %c0_i32_0 : i32, i32
  }
  func.func @transform_5(%arg0: i32, %arg1: i32) -> (i32, i32) {
    %c0_i32 = arith.constant 0 : i32
    %c0_i32_0 = arith.constant 0 : i32
    %c0_i32_1 = arith.constant 0 : i32
    return %c0_i32, %c0_i32_0 : i32, i32
  }
  func.func @transform_6(%arg0: i32, %arg1: i32) -> (i32, i32) {
    %c0_i32 = arith.constant 0 : i32
    %c0_i32_0 = arith.constant 0 : i32
    %c0_i32_1 = arith.constant 0 : i32
    return %c0_i32, %c0_i32_0 : i32, i32
  }
  func.func @transform_7(%arg0: i32, %arg1: i32) -> (i32, i32) {
    %c0_i32 = arith.constant 0 : i32
    %c0_i32_0 = arith.constant 0 : i32
    %c0_i32_1 = arith.constant 0 : i32
    return %c0_i32, %c0_i32_0 : i32, i32
  }
  func.func @transform_8(%arg0: i32, %arg1: i32) -> (i32, i32) {
    %c0_i32 = arith.constant 0 : i32
    %c0_i32_0 = arith.constant 0 : i32
    %c0_i32_1 = arith.constant 0 : i32
    return %c0_i32, %c0_i32_0 : i32, i32
  }
  func.func @transform_9(%arg0: i32, %arg1: i32) -> (i32, i32) {
    %c0_i32 = arith.constant 0 : i32
    %c0_i32_0 = arith.constant 0 : i32
    %c0_i32_1 = arith.constant 0 : i32
    return %c0_i32, %c0_i32_0 : i32, i32
  }
  func.func @transform_10(%arg0: i32, %arg1: i32) -> (i32, i32) {
    %c0_i32 = arith.constant 0 : i32
    %c0_i32_0 = arith.constant 0 : i32
    %c0_i32_1 = arith.constant 0 : i32
    return %c0_i32, %c0_i32_0 : i32, i32
  }
  func.func @transform_11(%arg0: i32, %arg1: i32) -> (i32, i32) {
    %c0_i32 = arith.constant 0 : i32
    %c0_i32_0 = arith.constant 0 : i32
    %c0_i32_1 = arith.constant 0 : i32
    return %c0_i32, %c0_i32_0 : i32, i32
  }
  func.func @transform_12(%arg0: i32, %arg1: i32) -> (i32, i32, i32) {
    %c0_i32 = arith.constant 0 : i32
    %c0_i32_0 = arith.constant 0 : i32
    return %arg0, %c0_i32, %arg1 : i32, i32, i32
  }
}

</mosaic_0001>

<bundles_post_ra>
// kernel: tpu_custom_call.1
= control target key start
LH: loop header
LB: loop body
LE: loop exit
PB: predicated region body
PF: predicated region fallthrough
CT: control target
= control target key end

     0   :  { %s3234_s0 = inlined_call_operand.<no memory space> [shape: f32[1], index: 0, kind: input, shape index: {}]   ;;  %s3235_s1 = inlined_call_operand.vmem [shape: f32[2,4,256], index: 1, kind: input, shape index: {}]   ;;  %s3236_s2 = inlined_call_operand.vmem [shape: bf16[32,4], index: 2, kind: input, shape index: {}]   ;;  %s3237_s3 = inlined_call_operand.vmem [shape: f32[32,1], index: 3, kind: input, shape index: {}]   ;;  %s3238_s4 = inlined_call_operand.vmem [shape: bf16[64,32], index: 4, kind: input, shape index: {}]   ;;  %s3239_s5 = inlined_call_operand.vmem [shape: f32[64,1], index: 5, kind: input, shape index: {}]   ;;  %s3240_s6 = inlined_call_operand.vmem [shape: bf16[128,64], index: 6, kind: input, shape index: {}]   ;;  %s3241_s7 = inlined_call_operand.vmem [shape: f32[128,1], index: 7, kind: input, shape index: {}]   ;;  %s3242_s8 = inlined_call_operand.vmem [shape: bf16[256,128], index: 8, kind: input, shape index: {}]   ;;  %s3243_s9 = inlined_call_operand.vmem [shape: f32[256,1], index: 9, kind: input, shape index: {}]   ;;  %s3244_s10 = inlined_call_operand.vmem [shape: f32[256,1], index: 10, kind: input, shape index: {}]   ;;  %s3245_s11 = inlined_call_operand.<no memory space> [shape: f32[1,1], index: 11, kind: input, shape index: {}]   ;;  %s3246_s12 = inlined_call_operand.hbm [shape: f32[2,1,256], index: 12, kind: output, shape index: {}]  }
   0x1   :  { %17 = sst [smem:[#allocation2]] %s3234_s0  ;;  %v18_v0 = vstv %s3245_s11 }
   0x2   :  { %19 = vst [vmem:[#allocation3] sm:$0x1] %v18_v0 }
   0x3   :  { %20 = vsyncpa [#allocation5], 0 }
   0x4   :  { %22 = vsyncpa [#allocation5 + $0x1], 0  ;;  %s2497_s25 = smov 0   ;;  %s2499_s26 = smov 0  }
   0x5   :  { %s2501_s27 = smov 0   ;;  %s2503_s28 = smov 0  }
   0x6   :  { %s2505_s29 = smov 0   ;;  %s2507_s30 = smov 0  }
   0x7 LB: > { %3265 = sst [smem:[#allocation7_spill]] %s2419_s29  ;;  %s2071_s0 = sadd.s32 4294967295, %s2423_s30   ;;  %s2423_s30 = sphi %s2507_s30, %s28_s30   ;;  %s2419_s29 = sphi %s2505_s29, %s3314_s29   ;;  %s2415_s28 = sphi %s2503_s28, %s3309_s28   ;;  %s2411_s27 = sphi %s2501_s27, %s3313_s27   ;;  %s2407_s26 = sphi %s2499_s26, %s3312_s26   ;;  %s2403_s25 = sphi %s2497_s25, %s3311_s25  }
   0x8   : > { %s2072_s11 = sadd.s32 4294967294, %s2423_s30   ;;  %s40_s13 = sadd.s32 1, %s2419_s29 }
   0x9   : > { %s308_s14 = sadd.s32 1, %s2411_s27  ;;  %p42_p0 = scmp.ge.s32.totalorder %s40_s13, 2 }
   0xa   : > { %p318_p1 = scmp.ne.s32.totalorder %s2411_s27, %s2407_s26  ;;  %p319_p2 = scmp.eq.s32.totalorder %s2071_s0, 1 }
   0xb   : > { %p324_p3 = scmp.ne.s32.totalorder %s2407_s26, %s2403_s25  ;;  %s3316_s13 = smov (%p42_p0, %s40_s13), 0 }
   0xc   : > { %3266 = sst [smem:[#allocation8_spill]] %s3316_s13  ;;  %p2537_p4 = por %p319_p2, %p318_p1 }
   0xd   : > { %p325_p5 = scmp.eq.s32.totalorder %s2072_s11, 1  ;;  %s303_s16 = ssub.s32 %s2419_s29, %s3316_s13 }
   0xe   : > { %p2075_p6 = scmp.ge.s32.totalorder %s2423_s30, 1  ;;  %p306_p7 = scmp.eq.s32.totalorder %s303_s16, 0 }
   0xf   : > { %p2544_p8 = por %p325_p5, %p324_p3  ;;  %p389_p9 = scmp.lt.s32.totalorder %s2423_s30, 3 }
  0x10   : > { %s2550_s18 = scalar_select %p306_p7, %s2411_s27, %s308_s14  }
  0x11   : > { %p390_p10 = pnand %p2075_p6, %p389_p9 }
  0x12   : > { %3269 = sst [smem:[#allocation9_spill]] %s2550_s18 }
  0x13   : > { %393 = sbr.rel (%p390_p10) target bundleno = 1052 (0x41c), region = 68 }
  0x18   : > { %v454_v1 = vld [vmem:[%s3237_s3 + $0x10] sm:$0xff]  ;;  %v452_v2 = vld [vmem:[%s3237_s3] sm:$0xff]  ;;  %p436_p11 = scmp.lt.s32.totalorder %s2415_s28, 1  ;;  %v2425_v3 = vmov 0   ;;  %v455_v6 = vld [vmem:[%s3237_s3 + $0x18] sm:$0xff]  ;;  %vm501_vm0 = vcmask 1041408  }
  0x19   : > { %2335 = vset.pattern.permute.xlu1 %v2425_v3  ;;  %2334 = vset.pattern.permute.xlu0 %v2425_v3  ;;  %v568_v4 = vld [vmem:[%s3239_s5 + $0x30] sm:$0xff]  ;;  %v453_v7 = vld [vmem:[%s3237_s3 + $0x8] sm:$0xff]  ;;  %v569_v8 = vld [vmem:[%s3239_s5 + $0x38] sm:$0xff]  ;;  %vm494_vm1 = vcmask 31744   ;;  %vm634_vm2 = vcmask 261120   ;;  %vm881_vm3 = vcmask 523264  }
  0x1a   : > { %476 = vperm.xlu0 %2334, %v454_v1   ;;  %466 = vperm.xlu1 %2335, %v452_v2   ;;  %s437_s23 = scalar_select %p436_p11, %s2415_s28, 1  ;;  %v566_v11 = vld [vmem:[%s3239_s5 + $0x20] sm:$0xff]  ;;  %v567_v12 = vld [vmem:[%s3239_s5 + $0x28] sm:$0xff]  ;;  %v564_v17 = vld [vmem:[%s3239_s5 + $0x10] sm:$0xff]  ;;  %vm1970_vm4 = vcmask 1040384  }
  0x1b   : > { %2336 = vset.pattern.permute.xlu2 %v2425_v3  ;;  %v2232_v18 = vld [vmem:[%s3236_s2] sm:$0xff]  ;;  %v565_v19 = vld [vmem:[%s3239_s5 + $0x18] sm:$0xff]  ;;  %v563_v21 = vld [vmem:[%s3239_s5 + $0x8] sm:$0xff]  ;;  %s1963_s21 = sld [smem:[#allocation2]]  ;;  %s432_s22 = sand.u32 1, %s2407_s26  }
  0x1c   : > { %s2231_s11 = sshll.u32 %s437_s23, 3  ;;  %606 = vperm.xlu2 %2336, %v568_v4   ;;  %v562_v20 = vld [vmem:[%s3239_s5] sm:$0xff]  ;;  %v738_v23 = vld [vmem:[%s3241_s7 + $0x8] sm:$0xff]  ;;  %v739_v24 = vld [vmem:[%s3241_s7 + $0x10] sm:$0xff]  ;;  %s2076_s23 = sshll.u32 %s432_s22, 1 }
  0x1d   : > { %s443_s19 = scalar_lea.vmem %s3235_s1, %s2231_s11  ;;  %v737_v22 = vld [vmem:[%s3241_s7] sm:$0xff]  ;;  %v2233_v25 = vld [vmem:[%s3236_s2 + $0x8] sm:$0xff]  ;;  %v740_v26 = vld [vmem:[%s3241_s7 + $0x18] sm:$0xff]  ;;  %s2228_s24 = sshll.u32 %s2415_s28, 1 }
  0x1e   : > { %v447_v5 = vld [vmem:[%s443_s19] sm:$0xff]  ;;  %v742_v28 = vld [vmem:[%s3241_s7 + $0x28] sm:$0xff]  ;;  %v743_v29 = vld [vmem:[%s3241_s7 + $0x30] sm:$0xff]  ;;  %s1991_s29 = scalar_lea.hbm %s3246_s12, %s2228_s24  ;;  %s434_s13 = scalar_lea.vmem [#allocation4], %s2076_s23 }
  0x1f   : > { %457 = vst [vmem:[#allocation1] ss:$2 sm:$0xff] %v447_v5  ;;  %v741_v27 = vld [vmem:[%s3241_s7 + $0x20] sm:$0xff]  ;;  %v744_v30 = vld [vmem:[%s3241_s7 + $0x38] sm:$0xff]  ;;  %v746_v32 = vld [vmem:[%s3241_s7 + $0x48] sm:$0xff]  ;;  %s1993_s18 = sshll.u32 %s434_s13, 4  ;;  %s1994_s18 = int_to_ptr.vmem [resolvable:$true] %s1993_s18 }
  0x20   : > { %v745_v31 = vld [vmem:[%s3241_s7 + $0x40] sm:$0xff]  ;;  %v747_v33 = vld [vmem:[%s3241_s7 + $0x50] sm:$0xff]  ;;  %v752_v35 = vld [vmem:[%s3241_s7 + $0x78] sm:$0xff]  ;;  %s1995_s14 = sshll.u32 %s1991_s29, 4  ;;  %s1979_s28 = scalar_lea.sflag [#allocation5], %s432_s22  ;;  %s1996_s14 = int_to_ptr.hbm [resolvable:$true] %s1995_s14 }
  0x21   : > { %v751_v34 = vld [vmem:[%s3241_s7 + $0x70] sm:$0xff]  ;;  %v749_v36 = vld [vmem:[%s3241_s7 + $0x60] sm:$0xff]  ;;  %v750_v37 = vld [vmem:[%s3241_s7 + $0x68] sm:$0xff]  ;;  %s2359_s16 = sshra.s32 %s1996_s14, 4  ;;  %s2365_s23 = scalar_lea.hbm %s3246_s12, 4  ;;  %s2360_s16 = int_to_ptr.hbm [resolvable:$true] %s2359_s16 }
  0x22   : > { %481 = vperm.xlu0 %2334, %v455_v6   ;;  %471 = vperm.xlu1 %2335, %v453_v7   ;;  %v748_v38 = vld [vmem:[%s3241_s7 + $0x58] sm:$0xff]  ;;  %v1068_v39 = vld [vmem:[%s3243_s9] sm:$0xff]  ;;  %v1069_v40 = vld [vmem:[%s3243_s9 + $0x8] sm:$0xff]  ;;  %s2361_s19 = scalar_lea.hbm %s2360_s16, 2  ;;  %p2366_p1 = scmp.lt.s32.totalorder %s2360_s16, %s3246_s12 }
  0x23   : > { %v1070_v41 = vld [vmem:[%s3243_s9 + $0x10] sm:$0xff]  ;;  %v1071_v42 = vld [vmem:[%s3243_s9 + $0x18] sm:$0xff]  ;;  %v1072_v43 = vld [vmem:[%s3243_s9 + $0x20] sm:$0xff]  ;;  %p2362_p12 = scmp.ne.s32.totalorder %s2360_s16, %s2361_s19  ;;  %p2367_p2 = scmp.lt.s32.totalorder %s2365_s23, %s2361_s19 }
  0x24   : > { %611 = vperm.xlu2 %2336, %v569_v8   ;;  %v1073_v44 = vld [vmem:[%s3243_s9 + $0x28] sm:$0xff]  ;;  %v1074_v45 = vld [vmem:[%s3243_s9 + $0x30] sm:$0xff]  ;;  %v1075_v46 = vld [vmem:[%s3243_s9 + $0x38] sm:$0xff] }
  0x25   : > { %v1076_v47 = vld [vmem:[%s3243_s9 + $0x40] sm:$0xff]  ;;  %v1077_v48 = vld [vmem:[%s3243_s9 + $0x48] sm:$0xff]  ;;  %v1078_v49 = vld [vmem:[%s3243_s9 + $0x50] sm:$0xff]  ;;  %p2363_p13 = pnand %p2362_p12, %p2537_p4  ;;  %p2368_p3 = por %p2367_p2, %p2366_p1 }
  0x26   : > { %v458_v9 = vld.sshfl [vmem:[#allocation1] sm:$0xff pattern:$0x75316420]  ;;  %v459_v10 = vld.sshfl [vmem:[#allocation1 + $0x8] sm:$0xff pattern:$0x75316420] }
  0x27   : > { %v462_v13 = vpack.c.bf16 %v458_v9, %v458_v9  ;;  %v463_v14 = vpack.c.bf16 %v459_v10, %v459_v10  ;;  %v1079_v50 = vld [vmem:[%s3243_s9 + $0x58] sm:$0xff]  ;;  %v1080_v51 = vld [vmem:[%s3243_s9 + $0x60] sm:$0xff]  ;;  %v1081_v52 = vld [vmem:[%s3243_s9 + $0x68] sm:$0xff]  ;;  %p2364_p0 = pneg %p2363_p13 }
  0x28   : > { %v1082_v53 = vld [vmem:[%s3243_s9 + $0x70] sm:$0xff]  ;;  %v1083_v54 = vld [vmem:[%s3243_s9 + $0x78] sm:$0xff]  ;;  %v1084_v55 = vld [vmem:[%s3243_s9 + $0x80] sm:$0xff] }
  0x29   : > { %v503_v15 = vsel %vm501_vm0, %v462_v13, 0  ;;  %v506_v16 = vsel %vm501_vm0, %v463_v14, 0  ;;  %v1085_v56 = vld [vmem:[%s3243_s9 + $0x88] sm:$0xff]  ;;  %v1086_v57 = vld [vmem:[%s3243_s9 + $0x90] sm:$0xff]  ;;  %v1087_v58 = vld [vmem:[%s3243_s9 + $0x98] sm:$0xff]  ;;  %p2369_p5 = pnand %p2368_p3, %p2364_p0 }
  0x2a   : > { %596 = vperm.xlu0 %2334, %v566_v11   ;;  %601 = vperm.xlu1 %2335, %v567_v12   ;;  %v1088_v59 = vld [vmem:[%s3243_s9 + $0xa0] sm:$0xff]  ;;  %v1089_v60 = vld [vmem:[%s3243_s9 + $0xa8] sm:$0xff]  ;;  %v1090_v61 = vld [vmem:[%s3243_s9 + $0xb0] sm:$0xff] }
  0x2b   : > { %515 = vmatpush.bf16.msra.mxu0 %v503_v15  ;;  %534 = vmatpush.bf16.msra.mxu1 %v506_v16  ;;  %v1091_v62 = vld [vmem:[%s3243_s9 + $0xb8] sm:$0xff]  ;;  %v1092_v63 = vld [vmem:[%s3243_s9 + $0xc0] sm:$0xff]  ;;  %v1093_v0 = vld [vmem:[%s3243_s9 + $0xc8] sm:$0xff] }
  0x2c   : > { %586 = vperm.xlu2 %2336, %v564_v17   ;;  %v1094_v1 = vld [vmem:[%s3243_s9 + $0xd0] sm:$0xff]  ;;  %v1095_v2 = vld [vmem:[%s3243_s9 + $0xd8] sm:$0xff]  ;;  %v1096_v3 = vld [vmem:[%s3243_s9 + $0xe0] sm:$0xff] }
  0x2d   : > { %v1097_v6 = vld [vmem:[%s3243_s9 + $0xe8] sm:$0xff]  ;;  %v1098_v7 = vld [vmem:[%s3243_s9 + $0xf0] sm:$0xff]  ;;  %v1099_v8 = vld [vmem:[%s3243_s9 + $0xf8] sm:$0xff] }
  0x2e   : > { %2087 = vmatmul.msk.bf16.vlgmr.msra.gmra.mxu0 %vm494_vm1, %v2232_v18  ;;  %2089 = vmatmul.msk.bf16.vlgmr.msra.gmra.mxu1 %vm494_vm1, %v2232_v18  ;;  %v1614_v11 = vld [vmem:[%s3244_s10] sm:$0xff]  ;;  %v1615_v12 = vld [vmem:[%s3244_s10 + $0x8] sm:$0xff]  ;;  %v1616_v15 = vld [vmem:[%s3244_s10 + $0x10] sm:$0xff] }
  0x2f   : > { %v1617_v18 = vld [vmem:[%s3244_s10 + $0x18] sm:$0xff] }
  0x32   : > { %591 = vperm.xlu0 %2334, %v565_v19   ;;  %576 = vperm.xlu1 %2335, %v562_v20   ;;  %v1618_v19 = vld [vmem:[%s3244_s10 + $0x20] sm:$0xff]  ;;  %v1619_v20 = vld [vmem:[%s3244_s10 + $0x28] sm:$0xff] }
  0x34   : > { %581 = vperm.xlu2 %2336, %v563_v21  }
  0x3a   : > { %763 = vperm.xlu0 %2334, %v737_v22   ;;  %768 = vperm.xlu1 %2335, %v738_v23  }
  0x3c   : > { %773 = vperm.xlu2 %2336, %v739_v24  }
  0x3e   : > { %2088 = vmatmul.msk.bf16.gmra.mxu0 %vm494_vm1, %v2233_v25  ;;  %2090 = vmatmul.msk.bf16.gmra.mxu1 %vm494_vm1, %v2233_v25 }
  0x42   : > { %778 = vperm.xlu0 %2334, %v740_v26   ;;  %783 = vperm.xlu1 %2335, %v741_v27  }
  0x44   : > { %788 = vperm.xlu2 %2336, %v742_v28  }
  0x4a   : > { %793 = vperm.xlu0 %2334, %v743_v29   ;;  %798 = vperm.xlu1 %2335, %v744_v30  }
  0x4c   : > { %803 = vperm.xlu2 %2336, %v745_v31  }
  0x52   : > { %808 = vperm.xlu0 %2334, %v746_v32   ;;  %813 = vperm.xlu1 %2335, %v747_v33  }
  0x54   : > { %833 = vperm.xlu2 %2336, %v751_v34  }
  0x5a   : > { %838 = vperm.xlu0 %2334, %v752_v35   ;;  %823 = vperm.xlu1 %2335, %v749_v36  }
  0x5c   : > { %828 = vperm.xlu2 %2336, %v750_v37  }
  0x62   : > { %818 = vperm.xlu0 %2334, %v748_v38   ;;  %1118 = vperm.xlu1 %2335, %v1068_v39  }
  0x64   : > { %1123 = vperm.xlu2 %2336, %v1069_v40  }
  0x6a   : > { %1128 = vperm.xlu0 %2334, %v1070_v41   ;;  %1133 = vperm.xlu1 %2335, %v1071_v42   ;;  %v1620_v41 = vld [vmem:[%s3244_s10 + $0x30] sm:$0xff]  ;;  %v1621_v42 = vld [vmem:[%s3244_s10 + $0x38] sm:$0xff] }
  0x6c   : > { %1138 = vperm.xlu2 %2336, %v1072_v43   ;;  %v1622_v43 = vld [vmem:[%s3244_s10 + $0x40] sm:$0xff] }
  0x72   : > { %1143 = vperm.xlu0 %2334, %v1073_v44   ;;  %1148 = vperm.xlu1 %2335, %v1074_v45  }
  0x74   : > { %1153 = vperm.xlu2 %2336, %v1075_v46  }
  0x7a   : > { %1158 = vperm.xlu0 %2334, %v1076_v47   ;;  %1163 = vperm.xlu1 %2335, %v1077_v48   ;;  %v2234_v48 = vld [vmem:[%s3238_s4] sm:$0xff] }
  0x7c   : > { %1168 = vperm.xlu2 %2336, %v1078_v49   ;;  %v1623_v49 = vld [vmem:[%s3244_s10 + $0x48] sm:$0xff] }
  0x82   : > { %1173 = vperm.xlu0 %2334, %v1079_v50   ;;  %1178 = vperm.xlu1 %2335, %v1080_v51   ;;  %v1624_v50 = vld [vmem:[%s3244_s10 + $0x50] sm:$0xff]  ;;  %v1625_v51 = vld [vmem:[%s3244_s10 + $0x58] sm:$0xff] }
  0x84   : > { %1183 = vperm.xlu2 %2336, %v1081_v52   ;;  %v1626_v52 = vld [vmem:[%s3244_s10 + $0x60] sm:$0xff] }
  0x8a   : > { %1188 = vperm.xlu0 %2334, %v1082_v53   ;;  %1193 = vperm.xlu1 %2335, %v1083_v54   ;;  %v1627_v53 = vld [vmem:[%s3244_s10 + $0x68] sm:$0xff]  ;;  %v1628_v54 = vld [vmem:[%s3244_s10 + $0x70] sm:$0xff] }
  0x8c   : > { %1198 = vperm.xlu2 %2336, %v1084_v55   ;;  %v477_v13 = vpop.permute.xlu0 %476  ;;  %v467_v14 = vpop.permute.xlu1 %466  ;;  %v2235_v55 = vld [vmem:[%s3238_s4 + $0x8] sm:$0xff] }
  0x92   : > { %1203 = vperm.xlu0 %2334, %v1085_v56   ;;  %1208 = vperm.xlu1 %2335, %v1086_v57   ;;  %v1629_v56 = vld [vmem:[%s3244_s10 + $0x78] sm:$0xff]  ;;  %v1630_v57 = vld [vmem:[%s3244_s10 + $0x80] sm:$0xff] }
  0x94   : > { %1213 = vperm.xlu2 %2336, %v1087_v58   ;;  %v482_v21 = vpop.permute.xlu0 %481  ;;  %v472_v22 = vpop.permute.xlu1 %471  ;;  %v1631_v58 = vld [vmem:[%s3244_s10 + $0x88] sm:$0xff] }
  0x9a   : > { %1218 = vperm.xlu0 %2334, %v1088_v59   ;;  %1223 = vperm.xlu1 %2335, %v1089_v60   ;;  %v1632_v59 = vld [vmem:[%s3244_s10 + $0x90] sm:$0xff]  ;;  %v1633_v60 = vld [vmem:[%s3244_s10 + $0x98] sm:$0xff] }
  0x9c   : > { %1228 = vperm.xlu2 %2336, %v1090_v61   ;;  %v1634_v61 = vld [vmem:[%s3244_s10 + $0xa0] sm:$0xff] }
  0xa2   : > { %1233 = vperm.xlu0 %2334, %v1091_v62   ;;  %1238 = vperm.xlu1 %2335, %v1092_v63   ;;  %v2236_v62 = vld [vmem:[%s3238_s4 + $0x10] sm:$0xff]  ;;  %v1635_v63 = vld [vmem:[%s3244_s10 + $0xa8] sm:$0xff] }
  0xa4   : > { %1243 = vperm.xlu2 %2336, %v1093_v0   ;;  %v1636_v0 = vld [vmem:[%s3244_s10 + $0xb0] sm:$0xff] }
  0xaa   : > { %1248 = vperm.xlu0 %2334, %v1094_v1   ;;  %1253 = vperm.xlu1 %2335, %v1095_v2   ;;  %v1637_v1 = vld [vmem:[%s3244_s10 + $0xb8] sm:$0xff]  ;;  %v1638_v2 = vld [vmem:[%s3244_s10 + $0xc0] sm:$0xff] }
  0xab   : > { %v517_v4 = vpop.f32.mrf.mxu0  ;;  %v536_v5 = vpop.f32.mrf.mxu1 }
  0xac   : > { %1258 = vperm.xlu2 %2336, %v1096_v3   ;;  %v518_v31 = vadd.f32 %v517_v4, %v467_v14  ;;  %v537_v32 = vadd.f32 %v536_v5, %v467_v14  ;;  %v1639_v3 = vld [vmem:[%s3244_s10 + $0xc8] sm:$0xff]  ;;  %v1640_v4 = vld [vmem:[%s3244_s10 + $0xd0] sm:$0xff]  ;;  %v2237_v5 = vld [vmem:[%s3238_s4 + $0x18] sm:$0xff] }
  0xae   : > { %v546_v44 = vmax.f32 %v518_v31, 0.0  ;;  %v547_v45 = vmax.f32 %v537_v32, 0.0 }
  0xb2   : > { %1263 = vperm.xlu0 %2334, %v1097_v6   ;;  %1268 = vperm.xlu1 %2335, %v1098_v7   ;;  %v1641_v6 = vld [vmem:[%s3244_s10 + $0xd8] sm:$0xff]  ;;  %v1642_v7 = vld [vmem:[%s3244_s10 + $0xe0] sm:$0xff] }
  0xb3   : > { %v519_v9 = vpop.f32.mrf.mxu0  ;;  %v538_v10 = vpop.f32.mrf.mxu1 }
  0xb4   : > { %1273 = vperm.xlu2 %2336, %v1099_v8   ;;  %v520_v27 = vadd.f32 %v519_v9, %v472_v22  ;;  %v539_v28 = vadd.f32 %v538_v10, %v472_v22  ;;  %v1643_v8 = vld [vmem:[%s3244_s10 + $0xe8] sm:$0xff]  ;;  %v1644_v9 = vld [vmem:[%s3244_s10 + $0xf0] sm:$0xff]  ;;  %v1645_v10 = vld [vmem:[%s3244_s10 + $0xf8] sm:$0xff]  ;;  %v607_v22 = vpop.permute.xlu2 %606 }
  0xb6   : > { %v548_v37 = vmax.f32 %v520_v27, 0.0  ;;  %v549_v38 = vmax.f32 %v539_v28, 0.0  ;;  %v597_v28 = vpop.permute.xlu0 %596 }
  0xb8   : > { %v570_v46 = vpack.c.bf16 %v548_v37, %v546_v44  ;;  %v571_v47 = vpack.c.bf16 %v549_v38, %v547_v45 }
  0xba   : > { %1649 = vperm.xlu0 %2334, %v1614_v11   ;;  %1654 = vperm.xlu1 %2335, %v1615_v12   ;;  %v1646_v11 = vld [vmem:[#allocation3] sm:$0x1] }
  0xbb   : > { %v522_v16 = vpop.f32.mrf.mxu0  ;;  %v541_v17 = vpop.f32.mrf.mxu1 }
  0xbc   : > { %1659 = vperm.xlu2 %2336, %v1616_v15   ;;  %v523_v23 = vadd.f32 %v522_v16, %v477_v13  ;;  %v542_v24 = vadd.f32 %v541_v17, %v477_v13 }
  0xbe   : > { %v550_v33 = vmax.f32 %v523_v23, 0.0  ;;  %v551_v34 = vmax.f32 %v542_v24, 0.0 }
  0xc2   : > { %1664 = vperm.xlu0 %2334, %v1617_v18   ;;  %1669 = vperm.xlu1 %2335, %v1618_v19  }
  0xc3   : > { %v524_v25 = vpop.f32.mrf.mxu0  ;;  %v543_v26 = vpop.f32.mrf.mxu1 }
  0xc4   : > { %v525_v29 = vadd.f32 %v524_v25, %v482_v21  ;;  %v544_v30 = vadd.f32 %v543_v26, %v482_v21  ;;  %1674 = vperm.xlu2 %2336, %v1619_v20   ;;  %v612_v25 = vpop.permute.xlu2 %611 }
  0xc6   : > { %v552_v35 = vmax.f32 %v525_v29, 0.0  ;;  %v553_v36 = vmax.f32 %v544_v30, 0.0  ;;  %v602_v30 = vpop.permute.xlu1 %601 }
  0xc8   : > { %v572_v39 = vpack.c.bf16 %v552_v35, %v550_v33  ;;  %v573_v40 = vpack.c.bf16 %v553_v36, %v551_v34 }
  0xca   : > { %653 = vmatpush.bf16.msra.mxu2 %v572_v39  ;;  %682 = vmatpush.bf16.msra.mxu3 %v573_v40 }
  0xcb   : > { %1679 = vperm.xlu0 %2334, %v1620_v41   ;;  %1684 = vperm.xlu1 %2335, %v1621_v42   ;;  %v592_v41 = vpop.permute.xlu0 %591 }
  0xcc   : > { %1689 = vperm.xlu2 %2336, %v1622_v43   ;;  %v587_v29 = vpop.permute.xlu2 %586 }
  0xce   : > { %654 = vmatpush.bf16.msra.mxu2 %v570_v46  ;;  %683 = vmatpush.bf16.msra.mxu3 %v571_v47 }
  0xd1   : > { %2107 = vmatmul.msk.bf16.vlgmr.msra.gmra.mxu2 %vm634_vm2, %v2234_v48  ;;  %2111 = vmatmul.msk.bf16.vlgmr.msra.gmra.mxu3 %vm634_vm2, %v2234_v48 }
  0xd3   : > { %1694 = vperm.xlu0 %2334, %v1623_v49   ;;  %1699 = vperm.xlu1 %2335, %v1624_v50  }
  0xd4   : > { %1704 = vperm.xlu2 %2336, %v1625_v51  }
  0xdb   : > { %1709 = vperm.xlu0 %2334, %v1626_v52   ;;  %1714 = vperm.xlu1 %2335, %v1627_v53   ;;  %v582_v52 = vpop.permute.xlu2 %581 }
  0xdc   : > { %1719 = vperm.xlu2 %2336, %v1628_v54  }
  0xe1   : > { %2108 = vmatmul.msk.bf16.gmra.mxu2 %vm634_vm2, %v2235_v55  ;;  %2112 = vmatmul.msk.bf16.gmra.mxu3 %vm634_vm2, %v2235_v55 }
  0xe3   : > { %1724 = vperm.xlu0 %2334, %v1629_v56   ;;  %1729 = vperm.xlu1 %2335, %v1630_v57  }
  0xe4   : > { %1734 = vperm.xlu2 %2336, %v1631_v58  }
  0xeb   : > { %1739 = vperm.xlu0 %2334, %v1632_v59   ;;  %1744 = vperm.xlu1 %2335, %v1633_v60  }
  0xec   : > { %1749 = vperm.xlu2 %2336, %v1634_v61  }
  0xf1   : > { %2109 = vmatmul.msk.bf16.gmra.mxu2 %vm634_vm2, %v2236_v62  ;;  %2113 = vmatmul.msk.bf16.gmra.mxu3 %vm634_vm2, %v2236_v62 }
  0xf3   : > { %1754 = vperm.xlu0 %2334, %v1635_v63   ;;  %1759 = vperm.xlu1 %2335, %v1636_v0   ;;  %v577_v63 = vpop.permute.xlu1 %576 }
  0xf4   : > { %1764 = vperm.xlu2 %2336, %v1637_v1  }
  0xfb   : > { %1769 = vperm.xlu0 %2334, %v1638_v2   ;;  %1774 = vperm.xlu1 %2335, %v1639_v3  }
  0xfc   : > { %1779 = vperm.xlu2 %2336, %v1640_v4  }
 0x101   : > { %2110 = vmatmul.msk.bf16.gmra.mxu2 %vm634_vm2, %v2237_v5  ;;  %2114 = vmatmul.msk.bf16.gmra.mxu3 %vm634_vm2, %v2237_v5 }
 0x103   : > { %1784 = vperm.xlu0 %2334, %v1641_v6   ;;  %1789 = vperm.xlu1 %2335, %v1642_v7  }
 0x104   : > { %1794 = vperm.xlu2 %2336, %v1643_v8  }
 0x10b   : > { %1799 = vperm.xlu0 %2334, %v1644_v9   ;;  %1804 = vperm.xlu1 %2335, %v1645_v10  }
 0x10c   : > { %1947 = vperm.xlu2 %2336, %v1646_v11  }
 0x154   : > { %v656_v12 = vpop.f32.mrf.mxu2  ;;  %v685_v13 = vpop.f32.mrf.mxu3 }
 0x155   : > { %v657_v0 = vadd.f32 %v656_v12, %v577_v63  ;;  %v686_v1 = vadd.f32 %v685_v13, %v577_v63  ;;  %v2239_v12 = vld [vmem:[%s3240_s6 + $0x8] sm:$0xff]  ;;  %v2240_v13 = vld [vmem:[%s3240_s6 + $0x10] sm:$0xff] }
 0x157   : > { %v705_v8 = vmax.f32 %v657_v0, 0.0  ;;  %v706_v9 = vmax.f32 %v686_v1, 0.0 }
 0x15c   : > { %v658_v14 = vpop.f32.mrf.mxu2  ;;  %v687_v15 = vpop.f32.mrf.mxu3 }
 0x15d   : > { %v659_v57 = vadd.f32 %v658_v14, %v582_v52  ;;  %v688_v58 = vadd.f32 %v687_v15, %v582_v52  ;;  %v2238_v14 = vld [vmem:[%s3240_s6] sm:$0xff]  ;;  %v2241_v15 = vld [vmem:[%s3240_s6 + $0x18] sm:$0xff] }
 0x15f   : > { %v707_v4 = vmax.f32 %v659_v57, 0.0  ;;  %v708_v5 = vmax.f32 %v688_v58, 0.0 }
 0x161   : > { %v753_v10 = vpack.c.bf16 %v707_v4, %v705_v8  ;;  %v754_v11 = vpack.c.bf16 %v708_v5, %v706_v9 }
 0x164   : > { %v661_v16 = vpop.f32.mrf.mxu2  ;;  %v690_v17 = vpop.f32.mrf.mxu3 }
 0x165   : > { %v662_v53 = vadd.f32 %v661_v16, %v587_v29  ;;  %v691_v54 = vadd.f32 %v690_v17, %v587_v29  ;;  %v2242_v16 = vld [vmem:[%s3240_s6 + $0x20] sm:$0xff]  ;;  %v2243_v17 = vld [vmem:[%s3240_s6 + $0x28] sm:$0xff] }
 0x167   : > { %v709_v2 = vmax.f32 %v662_v53, 0.0  ;;  %v710_v3 = vmax.f32 %v691_v54, 0.0 }
 0x16c   : > { %v663_v18 = vpop.f32.mrf.mxu2  ;;  %v692_v19 = vpop.f32.mrf.mxu3 }
 0x16d   : > { %v664_v46 = vadd.f32 %v663_v18, %v592_v41  ;;  %v693_v47 = vadd.f32 %v692_v19, %v592_v41  ;;  %v2244_v18 = vld [vmem:[%s3240_s6 + $0x30] sm:$0xff]  ;;  %v2245_v19 = vld [vmem:[%s3240_s6 + $0x38] sm:$0xff] }
 0x16f   : > { %v711_v59 = vmax.f32 %v664_v46, 0.0  ;;  %v712_v60 = vmax.f32 %v693_v47, 0.0 }
 0x171   : > { %v755_v6 = vpack.c.bf16 %v711_v59, %v709_v2  ;;  %v756_v7 = vpack.c.bf16 %v712_v60, %v710_v3 }
 0x174   : > { %v666_v20 = vpop.f32.mrf.mxu2  ;;  %v695_v21 = vpop.f32.mrf.mxu3 }
 0x175   : > { %v667_v39 = vadd.f32 %v666_v20, %v597_v28  ;;  %v696_v40 = vadd.f32 %v695_v21, %v597_v28 }
 0x177   : > { %v713_v55 = vmax.f32 %v667_v39, 0.0  ;;  %v714_v56 = vmax.f32 %v696_v40, 0.0  ;;  %v2913_v39 = vpop.permute.xlu1 %768 }
 0x17c   : > { %v668_v23 = vpop.f32.mrf.mxu2  ;;  %v697_v24 = vpop.f32.mrf.mxu3 }
 0x17d   : > { %v669_v35 = vadd.f32 %v668_v23, %v602_v30  ;;  %v698_v36 = vadd.f32 %v697_v24, %v602_v30  ;;  %v2911_v24 = vpop.permute.xlu0 %763 }
 0x17f   : > { %v715_v48 = vmax.f32 %v669_v35, 0.0  ;;  %v716_v49 = vmax.f32 %v698_v36, 0.0 }
 0x181   : > { %v757_v61 = vpack.c.bf16 %v715_v48, %v713_v55  ;;  %v758_v62 = vpack.c.bf16 %v716_v49, %v714_v56 }
 0x184   : > { %v671_v26 = vpop.f32.mrf.mxu2  ;;  %v700_v27 = vpop.f32.mrf.mxu3 }
 0x185   : > { %v672_v31 = vadd.f32 %v671_v26, %v607_v22  ;;  %v701_v32 = vadd.f32 %v700_v27, %v607_v22  ;;  %v774_v27 = vpop.permute.xlu2 %773  ;;  %v779_v28 = vpop.permute.xlu0 %778 }
 0x187   : > { %v717_v42 = vmax.f32 %v672_v31, 0.0  ;;  %v718_v43 = vmax.f32 %v701_v32, 0.0 }
 0x18c   : > { %v673_v33 = vpop.f32.mrf.mxu2  ;;  %v702_v34 = vpop.f32.mrf.mxu3 }
 0x18d   : > { %v674_v37 = vadd.f32 %v673_v33, %v612_v25  ;;  %v703_v38 = vadd.f32 %v702_v34, %v612_v25  ;;  %v794_v60 = vpop.permute.xlu0 %793 }
 0x18f   : > { %v719_v44 = vmax.f32 %v674_v37, 0.0  ;;  %v720_v45 = vmax.f32 %v703_v38, 0.0 }
 0x191   : > { %v759_v50 = vpack.c.bf16 %v719_v44, %v717_v42  ;;  %v760_v51 = vpack.c.bf16 %v720_v45, %v718_v43  ;;  %v784_v44 = vpop.permute.xlu1 %783  ;;  %v789_v45 = vpop.permute.xlu2 %788 }
 0x193   : > { %910 = vmatpush.bf16.msrb.mxu0 %v759_v50  ;;  %959 = vmatpush.bf16.msrb.mxu1 %v760_v51 }
 0x197   : > { %911 = vmatpush.bf16.msrb.mxu0 %v757_v61  ;;  %960 = vmatpush.bf16.msrb.mxu1 %v758_v62 }
 0x199   : > { %v799_v61 = vpop.permute.xlu1 %798 }
 0x19b   : > { %912 = vmatpush.bf16.msrb.mxu0 %v755_v6  ;;  %961 = vmatpush.bf16.msrb.mxu1 %v756_v7 }
 0x19f   : > { %913 = vmatpush.bf16.msrb.mxu0 %v753_v10  ;;  %962 = vmatpush.bf16.msrb.mxu1 %v754_v11 }
 0x1a2   : > { %2147 = vmatmul.msk.bf16.vlgmr.msrb.gmra.mxu0 %vm881_vm3, %v2238_v14  ;;  %2155 = vmatmul.msk.bf16.vlgmr.msrb.gmra.mxu1 %vm881_vm3, %v2238_v14 }
 0x1b2   : > { %2148 = vmatmul.msk.bf16.gmra.mxu0 %vm881_vm3, %v2239_v12  ;;  %2156 = vmatmul.msk.bf16.gmra.mxu1 %vm881_vm3, %v2239_v12 }
 0x1c2   : > { %2149 = vmatmul.msk.bf16.gmra.mxu0 %vm881_vm3, %v2240_v13  ;;  %2157 = vmatmul.msk.bf16.gmra.mxu1 %vm881_vm3, %v2240_v13 }
 0x1d2   : > { %2150 = vmatmul.msk.bf16.gmra.mxu0 %vm881_vm3, %v2241_v15  ;;  %2158 = vmatmul.msk.bf16.gmra.mxu1 %vm881_vm3, %v2241_v15 }
 0x1e2   : > { %2151 = vmatmul.msk.bf16.gmra.mxu0 %vm881_vm3, %v2242_v16  ;;  %2159 = vmatmul.msk.bf16.gmra.mxu1 %vm881_vm3, %v2242_v16 }
 0x1f2   : > { %2152 = vmatmul.msk.bf16.gmra.mxu0 %vm881_vm3, %v2243_v17  ;;  %2160 = vmatmul.msk.bf16.gmra.mxu1 %vm881_vm3, %v2243_v17 }
 0x202   : > { %2153 = vmatmul.msk.bf16.gmra.mxu0 %vm881_vm3, %v2244_v18  ;;  %2161 = vmatmul.msk.bf16.gmra.mxu1 %vm881_vm3, %v2244_v18 }
 0x212   : > { %2154 = vmatmul.msk.bf16.gmra.mxu0 %vm881_vm3, %v2245_v19  ;;  %2162 = vmatmul.msk.bf16.gmra.mxu1 %vm881_vm3, %v2245_v19 }
 0x21f   : > { %v2903_v20 = vpop.f32.mrf.mxu0  ;;  %v2905_v21 = vpop.f32.mrf.mxu1 }
 0x227   : > { %v2907_v22 = vpop.f32.mrf.mxu0  ;;  %v2909_v23 = vpop.f32.mrf.mxu1 }
 0x22f   : > { %v920_v25 = vpop.f32.mrf.mxu0  ;;  %v969_v26 = vpop.f32.mrf.mxu1 }
 0x230   : > { %v921_v29 = vadd.f32 %v920_v25, %v774_v27  ;;  %v970_v30 = vadd.f32 %v969_v26, %v774_v27  ;;  %v804_v25 = vpop.permute.xlu2 %803  ;;  %v809_v26 = vpop.permute.xlu0 %808 }
 0x232   : > { %v1008_v35 = vmax.f32 %v921_v29, 0.0  ;;  %v1009_v36 = vmax.f32 %v970_v30, 0.0  ;;  %v814_v30 = vpop.permute.xlu1 %813 }
 0x237   : > { %v922_v31 = vpop.f32.mrf.mxu0  ;;  %v971_v32 = vpop.f32.mrf.mxu1 }
 0x238   : > { %v923_v33 = vadd.f32 %v922_v31, %v779_v28  ;;  %v972_v34 = vadd.f32 %v971_v32, %v779_v28  ;;  %v834_v29 = vpop.permute.xlu2 %833 }
 0x23a   : > { %v1010_v37 = vmax.f32 %v923_v33, 0.0  ;;  %v1011_v38 = vmax.f32 %v972_v34, 0.0  ;;  %v839_v33 = vpop.permute.xlu0 %838 }
 0x23c   : > { %v2915_v40 = vpack.c.bf16 %v1010_v37, %v1008_v35  ;;  %v2917_v41 = vpack.c.bf16 %v1011_v38, %v1009_v36 }
 0x23f   : > { %v925_v42 = vpop.f32.mrf.mxu0  ;;  %v974_v43 = vpop.f32.mrf.mxu1 }
 0x240   : > { %v926_v46 = vadd.f32 %v925_v42, %v784_v44  ;;  %v975_v47 = vadd.f32 %v974_v43, %v784_v44  ;;  %v829_v34 = vpop.permute.xlu2 %828  ;;  %v824_v42 = vpop.permute.xlu1 %823 }
 0x242   : > { %v1012_v52 = vmax.f32 %v926_v46, 0.0  ;;  %v1013_v53 = vmax.f32 %v975_v47, 0.0 }
 0x247   : > { %v927_v48 = vpop.f32.mrf.mxu0  ;;  %v976_v49 = vpop.f32.mrf.mxu1 }
 0x248   : > { %v928_v50 = vadd.f32 %v927_v48, %v789_v45  ;;  %v977_v51 = vadd.f32 %v976_v49, %v789_v45 }
 0x24a   : > { %v1014_v54 = vmax.f32 %v928_v50, 0.0  ;;  %v1015_v55 = vmax.f32 %v977_v51, 0.0 }
 0x24c   : > { %v2919_v56 = vpack.c.bf16 %v1014_v54, %v1012_v52  ;;  %v2921_v57 = vpack.c.bf16 %v1015_v55, %v1013_v53  ;;  %v819_v52 = vpop.permute.xlu0 %818 }
 0x24f   : > { %v930_v58 = vpop.f32.mrf.mxu0  ;;  %v979_v59 = vpop.f32.mrf.mxu1 }
 0x250   : > { %v931_v62 = vadd.f32 %v930_v58, %v794_v60  ;;  %v980_v63 = vadd.f32 %v979_v59, %v794_v60 }
 0x252   : > { %v1016_v4 = vmax.f32 %v931_v62, 0.0  ;;  %v1017_v5 = vmax.f32 %v980_v63, 0.0 }
 0x257   : > { %v932_v0 = vpop.f32.mrf.mxu0  ;;  %v981_v1 = vpop.f32.mrf.mxu1 }
 0x258   : > { %v933_v2 = vadd.f32 %v932_v0, %v799_v61  ;;  %v982_v3 = vadd.f32 %v981_v1, %v799_v61 }
 0x25a   : > { %v1018_v6 = vmax.f32 %v933_v2, 0.0  ;;  %v1019_v7 = vmax.f32 %v982_v3, 0.0 }
 0x25c   : > { %v2923_v8 = vpack.c.bf16 %v1018_v6, %v1016_v4  ;;  %v2925_v9 = vpack.c.bf16 %v1019_v7, %v1017_v5 }
 0x25f   : > { %v935_v10 = vpop.f32.mrf.mxu0  ;;  %v984_v11 = vpop.f32.mrf.mxu1 }
 0x267   : > { %v937_v14 = vpop.f32.mrf.mxu0  ;;  %v986_v12 = vpop.f32.mrf.mxu1 }
 0x268   : > { %v938_v2 = vadd.f32 %v937_v14, %v809_v26  ;;  %v987_v5 = vadd.f32 %v986_v12, %v809_v26 }
 0x26f   : > { %v940_v13 = vpop.f32.mrf.mxu0  ;;  %v989_v15 = vpop.f32.mrf.mxu1 }
 0x270   : > { %v941_v62 = vadd.f32 %v940_v13, %v814_v30  ;;  %v990_v0 = vadd.f32 %v989_v15, %v814_v30  ;;  %v1022_v13 = vmax.f32 %v938_v2, 0.0  ;;  %v1023_v15 = vmax.f32 %v987_v5, 0.0  ;;  %v2259_v2 = vld [vmem:[%s3242_s8 + $0x68] sm:$0xff] }
 0x277   : > { %v942_v16 = vpop.f32.mrf.mxu0  ;;  %v991_v17 = vpop.f32.mrf.mxu1 }
 0x278   : > { %v943_v54 = vadd.f32 %v942_v16, %v819_v52  ;;  %v992_v60 = vadd.f32 %v991_v17, %v819_v52  ;;  %v936_v16 = vadd.f32 %v935_v10, %v804_v25  ;;  %v985_v17 = vadd.f32 %v984_v11, %v804_v25  ;;  %v2257_v52 = vld [vmem:[%s3242_s8 + $0x58] sm:$0xff] }
 0x279   : > { %v918_v10 = vadd.f32 %v2907_v22, %v2913_v39  ;;  %v967_v11 = vadd.f32 %v2909_v23, %v2913_v39  ;;  %v916_v25 = vadd.f32 %v2903_v20, %v2911_v24 }
 0x27a   : > { %v1026_v3 = vmax.f32 %v943_v54, 0.0  ;;  %v1027_v6 = vmax.f32 %v992_v60, 0.0  ;;  %v1021_v14 = vmax.f32 %v985_v17, 0.0 }
 0x27b   : > { %v1007_v30 = vmax.f32 %v967_v11, 0.0  ;;  %v1004_v22 = vmax.f32 %v916_v25, 0.0 }
 0x27c   : > { %v1109_v26 = vpack.c.bf16 %v1023_v15, %v1021_v14 }
 0x27f   : > { %v945_v18 = vpop.f32.mrf.mxu0  ;;  %v994_v19 = vpop.f32.mrf.mxu1 }
 0x280   : > { %v946_v46 = vadd.f32 %v945_v18, %v824_v42  ;;  %v995_v53 = vadd.f32 %v994_v19, %v824_v42  ;;  %v1024_v18 = vmax.f32 %v941_v62, 0.0  ;;  %v1025_v19 = vmax.f32 %v990_v0, 0.0 }
 0x282   : > { %v1028_v63 = vmax.f32 %v946_v46, 0.0  ;;  %v1029_v1 = vmax.f32 %v995_v53, 0.0  ;;  %v2256_v46 = vld [vmem:[%s3242_s8 + $0x50] sm:$0xff] }
 0x287   : > { %v947_v27 = vpop.f32.mrf.mxu0  ;;  %v996_v28 = vpop.f32.mrf.mxu1 }
 0x288   : > { %v948_v43 = vadd.f32 %v947_v27, %v829_v34  ;;  %v997_v47 = vadd.f32 %v996_v28, %v829_v34  ;;  %v1110_v27 = vpack.c.bf16 %v1026_v3, %v1024_v18  ;;  %v1111_v28 = vpack.c.bf16 %v1027_v6, %v1025_v19  ;;  %v2973_v34 = vpop.permute.xlu2 %1123 }
 0x28a   : > { %v1030_v55 = vmax.f32 %v948_v43, 0.0  ;;  %v1031_v61 = vmax.f32 %v997_v47, 0.0 }
 0x28c   : > { %v1112_v4 = vpack.c.bf16 %v1030_v55, %v1028_v63  ;;  %v1113_v7 = vpack.c.bf16 %v1031_v61, %v1029_v1 }
 0x28f   : > { %v950_v31 = vpop.f32.mrf.mxu0  ;;  %v999_v32 = vpop.f32.mrf.mxu1 }
 0x290   : > { %v951_v35 = vadd.f32 %v950_v31, %v834_v29  ;;  %v1000_v36 = vadd.f32 %v999_v32, %v834_v29  ;;  %v1020_v29 = vmax.f32 %v936_v16, 0.0  ;;  %v2249_v31 = vld [vmem:[%s3242_s8 + $0x18] sm:$0xff]  ;;  %v2254_v32 = vld [vmem:[%s3242_s8 + $0x40] sm:$0xff]  ;;  %v2985_v42 = vpop.permute.xlu2 %1138 }
 0x292   : > { %v1032_v48 = vmax.f32 %v951_v35, 0.0  ;;  %v1033_v49 = vmax.f32 %v1000_v36, 0.0  ;;  %v1108_v12 = vpack.c.bf16 %v1022_v13, %v1020_v29  ;;  %v2975_v35 = vpop.permute.xlu0 %1128  ;;  %v2250_v36 = vld [vmem:[%s3242_s8 + $0x20] sm:$0xff] }
 0x297   : > { %v952_v37 = vpop.f32.mrf.mxu0  ;;  %v1001_v38 = vpop.f32.mrf.mxu1 }
 0x298   : > { %v953_v44 = vadd.f32 %v952_v37, %v839_v33  ;;  %v1002_v45 = vadd.f32 %v1001_v38, %v839_v33  ;;  %v2971_v33 = vpop.permute.xlu1 %1118  ;;  %v2255_v37 = vld [vmem:[%s3242_s8 + $0x48] sm:$0xff] }
 0x29a   : > { %v1034_v50 = vmax.f32 %v953_v44, 0.0  ;;  %v1035_v51 = vmax.f32 %v1002_v45, 0.0  ;;  %v2987_v43 = vpop.permute.xlu0 %1143  ;;  %v2991_v45 = vpop.permute.xlu2 %1153 }
 0x29c   : > { %v1114_v58 = vpack.c.bf16 %v1034_v50, %v1032_v48  ;;  %v1115_v59 = vpack.c.bf16 %v1035_v51, %v1033_v49 }
 0x29e   : > { %1372 = vmatpush.bf16.msra.mxu0 %v1114_v58  ;;  %2262 = vmatpush.bf16.msrb.mxu2 %v1114_v58 }
 0x29f   : > { %1461 = vmatpush.bf16.msra.mxu1 %v1115_v59  ;;  %2270 = vmatpush.bf16.msrb.mxu3 %v1115_v59  ;;  %v2258_v59 = vld [vmem:[%s3242_s8 + $0x60] sm:$0xff] }
 0x2a0   : > { %v2983_v38 = vpop.permute.xlu1 %1133 }
 0x2a2   : > { %1373 = vmatpush.bf16.msra.mxu0 %v1112_v4  ;;  %2263 = vmatpush.bf16.msrb.mxu2 %v1112_v4  ;;  %v2996_v47 = vpop.permute.xlu0 %1158  ;;  %v3000_v49 = vpop.permute.xlu2 %1168 }
 0x2a3   : > { %1462 = vmatpush.bf16.msra.mxu1 %v1113_v7  ;;  %2271 = vmatpush.bf16.msrb.mxu3 %v1113_v7 }
 0x2a6   : > { %1374 = vmatpush.bf16.msra.mxu0 %v1110_v27  ;;  %2264 = vmatpush.bf16.msrb.mxu2 %v1110_v27 }
 0x2a7   : > { %1463 = vmatpush.bf16.msra.mxu1 %v1111_v28  ;;  %2272 = vmatpush.bf16.msrb.mxu3 %v1111_v28  ;;  %v2260_v28 = vld [vmem:[%s3242_s8 + $0x70] sm:$0xff] }
 0x2a8   : > { %v2989_v44 = vpop.permute.xlu1 %1148 }
 0x2aa   : > { %1375 = vmatpush.bf16.msra.mxu0 %v1108_v12  ;;  %2265 = vmatpush.bf16.msrb.mxu2 %v1108_v12  ;;  %v3002_v50 = vpop.permute.xlu0 %1173  ;;  %v3009_v53 = vpop.permute.xlu2 %1183 }
 0x2ab   : > { %1464 = vmatpush.bf16.msra.mxu1 %v1109_v26  ;;  %2273 = vmatpush.bf16.msrb.mxu3 %v1109_v26 }
 0x2ae   : > { %1376 = vmatpush.bf16.msra.mxu0 %v2923_v8  ;;  %2266 = vmatpush.bf16.msrb.mxu2 %v2923_v8  ;;  %v965_v8 = vadd.f32 %v2905_v21, %v2911_v24  ;;  %v2246_v21 = vld [vmem:[%s3242_s8] sm:$0xff]  ;;  %v2251_v24 = vld [vmem:[%s3242_s8 + $0x28] sm:$0xff] }
 0x2af   : > { %1465 = vmatpush.bf16.msra.mxu1 %v2925_v9  ;;  %2274 = vmatpush.bf16.msrb.mxu3 %v2925_v9  ;;  %v1006_v9 = vmax.f32 %v918_v10, 0.0 }
 0x2b0   : > { %v1005_v23 = vmax.f32 %v965_v8, 0.0  ;;  %v2998_v48 = vpop.permute.xlu1 %1163 }
 0x2b1   : > { %v1100_v20 = vpack.c.bf16 %v1006_v9, %v1004_v22 }
 0x2b2   : > { %1377 = vmatpush.bf16.msra.mxu0 %v2919_v56  ;;  %2267 = vmatpush.bf16.msrb.mxu2 %v2919_v56  ;;  %v1101_v39 = vpack.c.bf16 %v1007_v30, %v1005_v23  ;;  %v2248_v56 = vld [vmem:[%s3242_s8 + $0x10] sm:$0xff]  ;;  %v3011_v54 = vpop.permute.xlu0 %1188  ;;  %v3015_v58 = vpop.permute.xlu2 %1198 }
 0x2b3   : > { %1466 = vmatpush.bf16.msra.mxu1 %v2921_v57  ;;  %2275 = vmatpush.bf16.msrb.mxu3 %v2921_v57  ;;  %v2253_v57 = vld [vmem:[%s3242_s8 + $0x38] sm:$0xff]  ;;  %3270 = vst [vmem:[#allocation10_spill] sm:$0xff] %v3015_v58 }
 0x2b6   : > { %1378 = vmatpush.bf16.msra.mxu0 %v2915_v40  ;;  %2268 = vmatpush.bf16.msrb.mxu2 %v2915_v40  ;;  %v2247_v40 = vld [vmem:[%s3242_s8 + $0x8] sm:$0xff] }
 0x2b7   : > { %1467 = vmatpush.bf16.msra.mxu1 %v2917_v41  ;;  %2276 = vmatpush.bf16.msrb.mxu3 %v2917_v41  ;;  %v2252_v41 = vld [vmem:[%s3242_s8 + $0x30] sm:$0xff] }
 0x2b8   : > { %v3004_v51 = vpop.permute.xlu1 %1178 }
 0x2ba   : > { %1379 = vmatpush.bf16.msra.mxu0 %v1100_v20  ;;  %2269 = vmatpush.bf16.msrb.mxu2 %v1100_v20  ;;  %v3020_v60 = vpop.permute.xlu0 %1203  ;;  %v3024_v62 = vpop.permute.xlu2 %1213 }
 0x2bb   : > { %1468 = vmatpush.bf16.msra.mxu1 %v1101_v39  ;;  %2277 = vmatpush.bf16.msrb.mxu3 %v1101_v39  ;;  %3271 = vst [vmem:[#allocation11_spill] sm:$0xff] %v3020_v60  ;;  %v2261_v39 = vld [vmem:[%s3242_s8 + $0x78] sm:$0xff] }
 0x2bc   : > { %3273 = vst [vmem:[#allocation13_spill] sm:$0xff] %v3024_v62 }
 0x2bd   : > { %1380 = vmatmul.bf16.vlgmr.msra.gmra.mxu0 %v2246_v21  ;;  %1405 = vmatmul.bf16.vlgmr.msrb.gmra.mxu2 %v2251_v24 }
 0x2be   : > { %1469 = vmatmul.bf16.vlgmr.msra.gmra.mxu1 %v2246_v21  ;;  %1494 = vmatmul.bf16.vlgmr.msrb.gmra.mxu3 %v2251_v24 }
 0x2c0   : > { %v3013_v55 = vpop.permute.xlu1 %1193 }
 0x2c2   : > { %v3026_v63 = vpop.permute.xlu0 %1218  ;;  %v3030_v1 = vpop.permute.xlu2 %1228 }
 0x2c3   : > { %3274 = vst [vmem:[#allocation14_spill] sm:$0xff] %v3026_v63 }
 0x2c4   : > { %3276 = vst [vmem:[#allocation16_spill] sm:$0xff] %v3030_v1 }
 0x2c8   : > { %v3022_v61 = vpop.permute.xlu1 %1208 }
 0x2c9   : > { %3272 = vst [vmem:[#allocation12_spill] sm:$0xff] %v3022_v61 }
 0x2ca   : > { %v3035_v5 = vpop.permute.xlu0 %1233  ;;  %v3043_v18 = vpop.permute.xlu2 %1243 }
 0x2cb   : > { %3277 = vst [vmem:[#allocation17_spill] sm:$0xff] %v3035_v5 }
 0x2cc   : > { %3279 = vst [vmem:[#allocation19_spill] sm:$0xff] %v3043_v18 }
 0x2cd   : > { %1385 = vmatmul.bf16.gmra.mxu0 %v2247_v40  ;;  %1410 = vmatmul.bf16.gmra.mxu2 %v2252_v41 }
 0x2ce   : > { %1474 = vmatmul.bf16.gmra.mxu1 %v2247_v40  ;;  %1499 = vmatmul.bf16.gmra.mxu3 %v2252_v41 }
 0x2d0   : > { %v3028_v0 = vpop.permute.xlu1 %1223 }
 0x2d1   : > { %3275 = vst [vmem:[#allocation15_spill] sm:$0xff] %v3028_v0 }
 0x2d2   : > { %v3045_v13 = vpop.permute.xlu0 %1248  ;;  %v3056_v26 = vpop.permute.xlu2 %1258 }
 0x2d3   : > { %3280 = vst [vmem:[#allocation20_spill] sm:$0xff] %v3045_v13 }
 0x2d4   : > { %3282 = vst [vmem:[#allocation22_spill] sm:$0xff] %v3056_v26 }
 0x2d8   : > { %v3037_v6 = vpop.permute.xlu1 %1238 }
 0x2d9   : > { %3278 = vst [vmem:[#allocation18_spill] sm:$0xff] %v3037_v6 }
 0x2da   : > { %v3062_v25 = vpop.permute.xlu0 %1263  ;;  %v3066_v22 = vpop.permute.xlu2 %1273 }
 0x2db   : > { %3283 = vst [vmem:[#allocation23_spill] sm:$0xff] %v3062_v25 }
 0x2dc   : > { %3285 = vst [vmem:[#allocation25_spill] sm:$0xff] %v3066_v22 }
 0x2dd   : > { %1390 = vmatmul.bf16.gmra.mxu0 %v2248_v56  ;;  %1415 = vmatmul.bf16.gmra.mxu2 %v2253_v57 }
 0x2de   : > { %1479 = vmatmul.bf16.gmra.mxu1 %v2248_v56  ;;  %1504 = vmatmul.bf16.gmra.mxu3 %v2253_v57 }
 0x2e0   : > { %v3054_v29 = vpop.permute.xlu1 %1253 }
 0x2e1   : > { %3281 = vst [vmem:[#allocation21_spill] sm:$0xff] %v3054_v29 }
 0x2e2   : > { %v1650_v40 = vpop.permute.xlu0 %1649  ;;  %v1660_v56 = vpop.permute.xlu2 %1659 }
 0x2e8   : > { %v3064_v30 = vpop.permute.xlu1 %1268 }
 0x2e9   : > { %3284 = vst [vmem:[#allocation24_spill] sm:$0xff] %v3064_v30 }
 0x2ed   : > { %1395 = vmatmul.bf16.gmra.mxu0 %v2249_v31  ;;  %1420 = vmatmul.bf16.gmra.mxu2 %v2254_v32 }
 0x2ee   : > { %1484 = vmatmul.bf16.gmra.mxu1 %v2249_v31  ;;  %1509 = vmatmul.bf16.gmra.mxu3 %v2254_v32 }
 0x2f0   : > { %v1655_v41 = vpop.permute.xlu1 %1654 }
 0x2fd   : > { %1400 = vmatmul.bf16.gmra.mxu0 %v2250_v36  ;;  %1425 = vmatmul.bf16.gmra.mxu2 %v2255_v37 }
 0x2fe   : > { %1489 = vmatmul.bf16.gmra.mxu1 %v2250_v36  ;;  %1514 = vmatmul.bf16.gmra.mxu3 %v2255_v37  ;;  %v1665_v37 = vpop.permute.xlu0 %1664 }
 0x306   : > { %v3089_v29 = vpop.permute.xlu0 %1679 }
 0x30d   : > { %1430 = vmatmul.bf16.gmra.mxu2 %v2256_v46 }
 0x30e   : > { %1519 = vmatmul.bf16.gmra.mxu3 %v2256_v46  ;;  %v1670_v46 = vpop.permute.xlu1 %1669 }
 0x31d   : > { %1435 = vmatmul.bf16.gmra.mxu2 %v2257_v52 }
 0x31e   : > { %1524 = vmatmul.bf16.gmra.mxu3 %v2257_v52 }
 0x32d   : > { %1440 = vmatmul.bf16.gmra.mxu2 %v2258_v59 }
 0x32e   : > { %1529 = vmatmul.bf16.gmra.mxu3 %v2258_v59 }
 0x33a   : > { %v1381_v3 = vpop.f32.mrf.mxu0 }
 0x33b   : > { %v1470_v4 = vpop.f32.mrf.mxu1  ;;  %v1382_v25 = vadd.f32 %v1381_v3, %v2971_v33 }
 0x33c   : > { %v1471_v13 = vadd.f32 %v1470_v4, %v2971_v33 }
 0x33d   : > { %1445 = vmatmul.bf16.gmra.mxu2 %v2259_v2 }
 0x33e   : > { %1534 = vmatmul.bf16.gmra.mxu3 %v2259_v2  ;;  %v3083_v2 = vpop.permute.xlu2 %1674 }
 0x340   : > { %v3039_v7 = vpop.f32.mrf.mxu2 }
 0x341   : > { %v3041_v16 = vpop.f32.mrf.mxu3 }
 0x342   : > { %v1383_v17 = vpop.f32.mrf.mxu0 }
 0x343   : > { %v1472_v19 = vpop.f32.mrf.mxu1  ;;  %v1384_v30 = vadd.f32 %v1383_v17, %v2973_v34  ;;  %v3098_v17 = vpop.permute.xlu1 %1684 }
 0x345   : > { %v1552_v5 = vmax.f32 %v1384_v30, 0.0 }
 0x346   : > { %v3102_v4 = vpop.permute.xlu2 %1689 }
 0x348   : > { %v3047_v27 = vpop.f32.mrf.mxu2 }
 0x349   : > { %v3049_v15 = vpop.f32.mrf.mxu3 }
 0x34a   : > { %v1386_v14 = vpop.f32.mrf.mxu0 }
 0x34b   : > { %v1475_v12 = vpop.f32.mrf.mxu1  ;;  %v1387_v26 = vadd.f32 %v1386_v14, %v2975_v35  ;;  %v1550_v14 = vmax.f32 %v1382_v25, 0.0 }
 0x34c   : > { %v1476_v18 = vadd.f32 %v1475_v12, %v2975_v35  ;;  %v1551_v35 = vmax.f32 %v1471_v13, 0.0 }
 0x34d   : > { %1450 = vmatmul.bf16.gmra.mxu2 %v2260_v28  ;;  %v1554_v63 = vmax.f32 %v1387_v26, 0.0 }
 0x34e   : > { %1539 = vmatmul.bf16.gmra.mxu3 %v2260_v28  ;;  %v1555_v12 = vmax.f32 %v1476_v18, 0.0 }
 0x34f   : > { %v1811_v25 = vmul.f32 %v1660_v56, %v1554_v63 }
 0x350   : > { %v3058_v10 = vpop.f32.mrf.mxu2  ;;  %v1812_v58 = vmul.f32 %v1660_v56, %v1555_v12 }
 0x351   : > { %v3060_v11 = vpop.f32.mrf.mxu3 }
 0x352   : > { %v1388_v8 = vpop.f32.mrf.mxu0 }
 0x353   : > { %v1477_v9 = vpop.f32.mrf.mxu1  ;;  %v1389_v1 = vadd.f32 %v1388_v8, %v2983_v38  ;;  %v1809_v8 = vmul.f32 %v1655_v41, %v1552_v5 }
 0x354   : > { %v1478_v3 = vadd.f32 %v1477_v9, %v2983_v38  ;;  %v1807_v9 = vmul.f32 %v1650_v40, %v1550_v14 }
 0x355   : > { %v1556_v61 = vmax.f32 %v1389_v1, 0.0 }
 0x357   : > { %v1813_v1 = vmul.f32 %v1665_v37, %v1556_v61  ;;  %v1700_v61 = vpop.permute.xlu1 %1699 }
 0x358   : > { %v3068_v23 = vpop.f32.mrf.mxu2 }
 0x359   : > { %v3070_v20 = vpop.f32.mrf.mxu3 }
 0x35a   : > { %v1391_v21 = vpop.f32.mrf.mxu0 }
 0x35b   : > { %v1480_v24 = vpop.f32.mrf.mxu1  ;;  %v1392_v62 = vadd.f32 %v1391_v21, %v2985_v42 }
 0x35c   : > { %v1481_v30 = vadd.f32 %v1480_v24, %v2985_v42  ;;  %v1871_v42 = vadd.f32 %v1809_v8, %v1807_v9 }
 0x35d   : > { %1455 = vmatmul.bf16.gmra.mxu2 %v2261_v39  ;;  %v1558_v26 = vmax.f32 %v1392_v62, 0.0 }
 0x35e   : > { %1544 = vmatmul.bf16.gmra.mxu3 %v2261_v39  ;;  %v1473_v39 = vadd.f32 %v1472_v19, %v2973_v34 }
 0x360   : > { %v3075_v57 = vpop.f32.mrf.mxu2  ;;  %v1553_v34 = vmax.f32 %v1473_v39, 0.0  ;;  %v1557_v39 = vmax.f32 %v1478_v3, 0.0 }
 0x361   : > { %v3077_v31 = vpop.f32.mrf.mxu3 }
 0x362   : > { %v1393_v32 = vpop.f32.mrf.mxu0  ;;  %v1814_v62 = vmul.f32 %v1665_v37, %v1557_v39  ;;  %v1705_v37 = vpop.permute.xlu2 %1704 }
 0x363   : > { %v1482_v36 = vpop.f32.mrf.mxu1  ;;  %v1394_v60 = vadd.f32 %v1393_v32, %v2987_v43 }
 0x364   : > { %v1483_v38 = vadd.f32 %v1482_v36, %v2987_v43  ;;  %v3114_v43 = vpop.permute.xlu0 %1694  ;;  %v1872_v36 = vadd.f32 %v1871_v42, %v1811_v25 }
 0x365   : > { %v1560_v5 = vmax.f32 %v1394_v60, 0.0 }
 0x366   : > { %v1561_v32 = vmax.f32 %v1483_v38, 0.0 }
 0x368   : > { %v3079_v52 = vpop.f32.mrf.mxu2 }
 0x369   : > { %v3081_v59 = vpop.f32.mrf.mxu3 }
 0x36a   : > { %3286 = vst [vmem:[#allocation26_spill] sm:$0xff] %v3081_v59  ;;  %v1396_v28 = vpop.f32.mrf.mxu0  ;;  %v1559_v59 = vmax.f32 %v1481_v30, 0.0 }
 0x36b   : > { %v1485_v22 = vpop.f32.mrf.mxu1  ;;  %v1397_v21 = vadd.f32 %v1396_v28, %v2989_v44  ;;  %v1815_v28 = vmul.f32 %v1670_v46, %v1558_v26 }
 0x36c   : > { %v1486_v18 = vadd.f32 %v1485_v22, %v2989_v44  ;;  %v1816_v3 = vmul.f32 %v1670_v46, %v1559_v59 }
 0x36d   : > { %v1562_v44 = vmax.f32 %v1397_v21, 0.0 }
 0x36f   : > { %v1819_v8 = vmul.f32 %v3089_v29, %v1562_v44  ;;  %v1501_v44 = vadd.f32 %v3060_v11, %v3004_v51  ;;  %v1417_v11 = vadd.f32 %v3075_v57, %v3011_v54 }
 0x370   : > { %v3093_v6 = vpop.f32.mrf.mxu2 }
 0x371   : > { %3287 = vst [vmem:[#allocation27_spill] sm:$0xff] %v3093_v6  ;;  %v3096_v0 = vpop.f32.mrf.mxu3  ;;  %v1808_v6 = vmul.f32 %v1650_v40, %v1551_v35  ;;  %v1873_v35 = vadd.f32 %v1872_v36, %v1813_v1  ;;  %v1715_v36 = vpop.permute.xlu1 %1714 }
 0x372   : > { %3288 = vst [vmem:[#allocation28_spill] sm:$0xff] %v3096_v0  ;;  %v1398_v19 = vpop.f32.mrf.mxu0  ;;  %v1810_v0 = vmul.f32 %v1655_v41, %v1553_v34 }
 0x373   : > { %v1487_v33 = vpop.f32.mrf.mxu1  ;;  %v1399_v24 = vadd.f32 %v1398_v19, %v2991_v45  ;;  %v1563_v19 = vmax.f32 %v1486_v18, 0.0  ;;  %v1874_v30 = vadd.f32 %v1873_v35, %v1815_v28 }
 0x374   : > { %v1908_v63 = vadd.f32 %v1810_v0, %v1808_v6  ;;  %v1488_v40 = vadd.f32 %v1487_v33, %v2991_v45  ;;  %v1817_v0 = vmul.f32 %v3083_v2, %v1560_v5  ;;  %v1818_v45 = vmul.f32 %v3083_v2, %v1561_v32 }
 0x375   : > { %v1564_v6 = vmax.f32 %v1399_v24, 0.0  ;;  %v1496_v2 = vadd.f32 %v3041_v16, %v3000_v49 }
 0x376   : > { %v1909_v60 = vadd.f32 %v1908_v63, %v1812_v58  ;;  %v1565_v33 = vmax.f32 %v1488_v40, 0.0  ;;  %v1820_v58 = vmul.f32 %v3089_v29, %v1563_v19  ;;  %v1875_v9 = vadd.f32 %v1874_v30, %v1817_v0  ;;  %v1710_v63 = vpop.permute.xlu0 %1709 }
 0x377   : > { %v1821_v25 = vmul.f32 %v3098_v17, %v1564_v6  ;;  %v1409_v29 = vadd.f32 %v3047_v27, %v3002_v50  ;;  %v1412_v40 = vadd.f32 %v3058_v10, %v3004_v51  ;;  %v1571_v28 = vmax.f32 %v1496_v2, 0.0 }
 0x378   : > { %v3109_v13 = vpop.f32.mrf.mxu2  ;;  %v1910_v12 = vadd.f32 %v1909_v60, %v1814_v62  ;;  %v1822_v18 = vmul.f32 %v3098_v17, %v1565_v33  ;;  %v1876_v1 = vadd.f32 %v1875_v9, %v1819_v8  ;;  %v1498_v62 = vadd.f32 %v3049_v15, %v3002_v50 }
 0x379   : > { %v3112_v41 = vpop.f32.mrf.mxu3  ;;  %v1572_v60 = vmax.f32 %v1409_v29, 0.0  ;;  %v1414_v50 = vadd.f32 %v3068_v23, %v3009_v53  ;;  %v1503_v10 = vadd.f32 %v3070_v20, %v3009_v53  ;;  %v1574_v51 = vmax.f32 %v1412_v40, 0.0 }
 0x37a   : > { %v1401_v56 = vpop.f32.mrf.mxu0  ;;  %v1911_v38 = vadd.f32 %v1910_v12, %v1816_v3  ;;  %v1877_v27 = vadd.f32 %v1876_v1, %v1821_v25  ;;  %v1573_v3 = vmax.f32 %v1498_v62, 0.0  ;;  %v1828_v23 = vmul.f32 %v1700_v61, %v1571_v28  ;;  %v3291_v25 = vld [vmem:[#allocation27_spill] sm:$0xff] }
 0x37b   : > { %v1402_v22 = vadd.f32 %v1401_v56, %v2996_v47  ;;  %v1490_v34 = vpop.f32.mrf.mxu1  ;;  %v1506_v33 = vadd.f32 %v3077_v31, %v3011_v54  ;;  %v1829_v8 = vmul.f32 %v1705_v37, %v1572_v60  ;;  %v1419_v53 = vadd.f32 %v3079_v52, %v3013_v55 }
 0x37c   : > { %v1491_v14 = vadd.f32 %v1490_v34, %v2996_v47  ;;  %v1407_v47 = vadd.f32 %v3039_v7, %v3000_v49  ;;  %v1912_v21 = vadd.f32 %v1911_v38, %v1818_v45  ;;  %v1575_v45 = vmax.f32 %v1501_v44, 0.0 }
 0x37d   : > { %v1566_v39 = vmax.f32 %v1402_v22, 0.0  ;;  %v1577_v38 = vmax.f32 %v1503_v10, 0.0  ;;  %v1578_v9 = vmax.f32 %v1417_v11, 0.0 }
 0x37e   : > { %v1567_v46 = vmax.f32 %v1491_v14, 0.0  ;;  %v1913_v32 = vadd.f32 %v1912_v21, %v1820_v58  ;;  %v1570_v17 = vmax.f32 %v1407_v47, 0.0  ;;  %v3289_v58 = vld [vmem:[#allocation26_spill] sm:$0xff]  ;;  %v1831_v47 = vmul.f32 %v1710_v63, %v1574_v51  ;;  %v1725_v54 = vpop.permute.xlu0 %1724 }
 0x37f   : > { %v1823_v5 = vmul.f32 %v3102_v4, %v1566_v39  ;;  %v1576_v39 = vmax.f32 %v1414_v50, 0.0  ;;  %v1832_v31 = vmul.f32 %v1710_v63, %v1575_v45  ;;  %v1834_v62 = vmul.f32 %v1715_v36, %v1577_v38 }
 0x380   : > { %v3123_v59 = vpop.f32.mrf.mxu2  ;;  %v1824_v49 = vmul.f32 %v3102_v4, %v1567_v46  ;;  %v1914_v22 = vadd.f32 %v1913_v32, %v1822_v18  ;;  %v1720_v4 = vpop.permute.xlu2 %1719  ;;  %v1827_v0 = vmul.f32 %v1700_v61, %v1570_v17  ;;  %v1508_v46 = vadd.f32 %v3289_v58, %v3013_v55  ;;  %v3290_v61 = vld [vmem:[#allocation10_spill] sm:$0xff] }
 0x381   : > { %v3128_v26 = vpop.f32.mrf.mxu3  ;;  %v1878_v15 = vadd.f32 %v1877_v27, %v1823_v5  ;;  %v1422_v2 = vadd.f32 %v3291_v25, %v3290_v61  ;;  %v1579_v18 = vmax.f32 %v1506_v33, 0.0  ;;  %v1833_v1 = vmul.f32 %v1715_v36, %v1576_v39  ;;  %v3293_v5 = vld [vmem:[#allocation11_spill] sm:$0xff]  ;;  %v3294_v27 = vld [vmem:[#allocation12_spill] sm:$0xff] }
 0x382   : > { %v1403_v42 = vpop.f32.mrf.mxu0  ;;  %v1915_v19 = vadd.f32 %v1914_v22, %v1824_v49  ;;  %v1581_v32 = vmax.f32 %v1508_v46, 0.0  ;;  %v1513_v49 = vadd.f32 %v3112_v41, %v3293_v5  ;;  %v1835_v63 = vmul.f32 %v1720_v4, %v1578_v9 }
 0x383   : > { %v1404_v7 = vadd.f32 %v1403_v42, %v2998_v48  ;;  %v1492_v24 = vpop.f32.mrf.mxu1  ;;  %v3292_v42 = vld [vmem:[#allocation28_spill] sm:$0xff]  ;;  %v1582_v40 = vmax.f32 %v1422_v2, 0.0 }
 0x384   : > { %v1493_v16 = vadd.f32 %v1492_v24, %v2998_v48  ;;  %v1511_v29 = vadd.f32 %v3292_v42, %v3290_v61  ;;  %v1730_v24 = vpop.permute.xlu1 %1729  ;;  %v1838_v10 = vmul.f32 %v1725_v54, %v1581_v32 }
 0x385   : > { %v1568_v56 = vmax.f32 %v1404_v7, 0.0  ;;  %v1424_v7 = vadd.f32 %v3109_v13, %v3293_v5  ;;  %v1516_v13 = vadd.f32 %v3128_v26, %v3294_v27 }
 0x386   : > { %v1569_v34 = vmax.f32 %v1493_v16, 0.0  ;;  %v1583_v60 = vmax.f32 %v1511_v29, 0.0 }
 0x387   : > { %v1825_v48 = vmul.f32 %v3114_v43, %v1568_v56  ;;  %v1427_v56 = vadd.f32 %v3123_v59, %v3294_v27  ;;  %v1839_v59 = vmul.f32 %v1730_v24, %v1582_v40  ;;  %v1587_v45 = vmax.f32 %v1516_v13, 0.0  ;;  %v3298_v13 = vld [vmem:[#allocation16_spill] sm:$0xff] }
 0x388   : > { %v1826_v14 = vmul.f32 %v3114_v43, %v1569_v34  ;;  %v1428_v35 = vpop.f32.mrf.mxu2  ;;  %v1830_v43 = vmul.f32 %v1705_v37, %v1573_v3  ;;  %v1580_v37 = vmax.f32 %v1419_v53, 0.0  ;;  %v1735_v22 = vpop.permute.xlu2 %1734  ;;  %v1836_v34 = vmul.f32 %v1720_v4, %v1579_v18 }
 0x389   : > { %v1879_v6 = vadd.f32 %v1878_v15, %v1825_v48  ;;  %v1517_v12 = vpop.f32.mrf.mxu3  ;;  %v1584_v15 = vmax.f32 %v1424_v7, 0.0  ;;  %v3295_v48 = vld [vmem:[#allocation13_spill] sm:$0xff]  ;;  %v1586_v51 = vmax.f32 %v1427_v56, 0.0 }
 0x38a   : > { %v1916_v30 = vadd.f32 %v1915_v19, %v1826_v14  ;;  %v1837_v50 = vmul.f32 %v1725_v54, %v1580_v37  ;;  %v1429_v41 = vadd.f32 %v1428_v35, %v3295_v48  ;;  %v1585_v19 = vmax.f32 %v1513_v49, 0.0  ;;  %v1740_v35 = vpop.permute.xlu0 %1739 }
 0x38b   : > { %v1880_v20 = vadd.f32 %v1879_v6, %v1827_v0  ;;  %v1518_v14 = vadd.f32 %v1517_v12, %v3295_v48  ;;  %v3296_v6 = vld [vmem:[#allocation14_spill] sm:$0xff]  ;;  %v1843_v12 = vmul.f32 %v1740_v35, %v1586_v51  ;;  %v1844_v9 = vmul.f32 %v1740_v35, %v1587_v45 }
 0x38c   : > { %v1917_v57 = vadd.f32 %v1916_v30, %v1828_v23  ;;  %v1840_v23 = vmul.f32 %v1730_v24, %v1583_v60  ;;  %v1841_v30 = vmul.f32 %v1735_v22, %v1584_v15  ;;  %v1842_v53 = vmul.f32 %v1735_v22, %v1585_v19  ;;  %v3300_v51 = vld [vmem:[#allocation18_spill] sm:$0xff] }
 0x38d   : > { %v1881_v21 = vadd.f32 %v1880_v20, %v1829_v8  ;;  %v1588_v8 = vmax.f32 %v1429_v41, 0.0  ;;  %v1589_v20 = vmax.f32 %v1518_v14, 0.0 }
 0x38e   : > { %v1918_v52 = vadd.f32 %v1917_v57, %v1830_v43 }
 0x38f   : > { %v1882_v55 = vadd.f32 %v1881_v21, %v1831_v47  ;;  %v1745_v47 = vpop.permute.xlu1 %1744 }
 0x390   : > { %v1919_v16 = vadd.f32 %v1918_v52, %v1832_v31  ;;  %v1431_v17 = vpop.f32.mrf.mxu2  ;;  %v1845_v2 = vmul.f32 %v1745_v47, %v1588_v8  ;;  %v1750_v54 = vpop.permute.xlu2 %1749  ;;  %v1846_v31 = vmul.f32 %v1745_v47, %v1589_v20 }
 0x391   : > { %v1883_v28 = vadd.f32 %v1882_v55, %v1833_v1  ;;  %v1520_v44 = vpop.f32.mrf.mxu3  ;;  %v1432_v4 = vadd.f32 %v1431_v17, %v3296_v6 }
 0x392   : > { %v1920_v36 = vadd.f32 %v1919_v16, %v1834_v62  ;;  %v1521_v26 = vadd.f32 %v1520_v44, %v3296_v6 }
 0x393   : > { %v1884_v3 = vadd.f32 %v1883_v28, %v1835_v63  ;;  %v1590_v46 = vmax.f32 %v1432_v4, 0.0  ;;  %v1755_v28 = vpop.permute.xlu0 %1754 }
 0x394   : > { %v1921_v0 = vadd.f32 %v1920_v36, %v1836_v34  ;;  %v1591_v25 = vmax.f32 %v1521_v26, 0.0  ;;  %v3297_v34 = vld [vmem:[#allocation15_spill] sm:$0xff] }
 0x395   : > { %v1885_v11 = vadd.f32 %v1884_v3, %v1837_v50  ;;  %v1847_v29 = vmul.f32 %v1750_v54, %v1590_v46  ;;  %v3299_v3 = vld [vmem:[#allocation17_spill] sm:$0xff] }
 0x396   : > { %v1922_v33 = vadd.f32 %v1921_v0, %v1838_v10  ;;  %v1848_v1 = vmul.f32 %v1750_v54, %v1591_v25 }
 0x397   : > { %v1886_v39 = vadd.f32 %v1885_v11, %v1839_v59  ;;  %v1760_v44 = vpop.permute.xlu1 %1759 }
 0x398   : > { %v1923_v43 = vadd.f32 %v1922_v33, %v1840_v23  ;;  %v1433_v38 = vpop.f32.mrf.mxu2  ;;  %v1765_v15 = vpop.permute.xlu2 %1764  ;;  %v3301_v33 = vld [vmem:[#allocation19_spill] sm:$0xff] }
 0x399   : > { %v1887_v58 = vadd.f32 %v1886_v39, %v1841_v30  ;;  %v1522_v57 = vpop.f32.mrf.mxu3  ;;  %v1434_v60 = vadd.f32 %v1433_v38, %v3297_v34  ;;  %v3302_v38 = vld [vmem:[#allocation20_spill] sm:$0xff] }
 0x39a   : > { %v1924_v61 = vadd.f32 %v1923_v43, %v1842_v53  ;;  %v1523_v48 = vadd.f32 %v1522_v57, %v3297_v34 }
 0x39b   : > { %v1888_v21 = vadd.f32 %v1887_v58, %v1843_v12  ;;  %v1770_v19 = vpop.permute.xlu0 %1769  ;;  %v1592_v0 = vmax.f32 %v1434_v60, 0.0 }
 0x39c   : > { %v1925_v18 = vadd.f32 %v1924_v61, %v1844_v9  ;;  %v1593_v6 = vmax.f32 %v1523_v48, 0.0  ;;  %v3306_v48 = vld [vmem:[#allocation24_spill] sm:$0xff] }
 0x39d   : > { %v1889_v42 = vadd.f32 %v1888_v21, %v1845_v2  ;;  %v1849_v53 = vmul.f32 %v1755_v28, %v1592_v0  ;;  %v3303_v21 = vld [vmem:[#allocation21_spill] sm:$0xff] }
 0x39e   : > { %v1926_v52 = vadd.f32 %v1925_v18, %v1846_v31  ;;  %v1850_v46 = vmul.f32 %v1755_v28, %v1593_v6  ;;  %v3305_v28 = vld [vmem:[#allocation23_spill] sm:$0xff] }
 0x39f   : > { %v1890_v37 = vadd.f32 %v1889_v42, %v1847_v29  ;;  %v1775_v30 = vpop.permute.xlu1 %1774 }
 0x3a0   : > { %v1927_v5 = vadd.f32 %v1926_v52, %v1848_v1  ;;  %v1436_v7 = vpop.f32.mrf.mxu2  ;;  %v1780_v31 = vpop.permute.xlu2 %1779 }
 0x3a1   : > { %v1525_v55 = vpop.f32.mrf.mxu3  ;;  %v1437_v36 = vadd.f32 %v1436_v7, %v3298_v13  ;;  %v1891_v61 = vadd.f32 %v1890_v37, %v1849_v53 }
 0x3a2   : > { %v1526_v41 = vadd.f32 %v1525_v55, %v3298_v13  ;;  %v1928_v18 = vadd.f32 %v1927_v5, %v1850_v46 }
 0x3a3   : > { %v1594_v59 = vmax.f32 %v1437_v36, 0.0 }
 0x3a4   : > { %v1595_v4 = vmax.f32 %v1526_v41, 0.0 }
 0x3a5   : > { %v1851_v20 = vmul.f32 %v1760_v44, %v1594_v59 }
 0x3a6   : > { %v1852_v57 = vmul.f32 %v1760_v44, %v1595_v4 }
 0x3a7   : > { %v1892_v1 = vadd.f32 %v1891_v61, %v1851_v20 }
 0x3a8   : > { %v1438_v24 = vpop.f32.mrf.mxu2 }
 0x3a9   : > { %v1527_v62 = vpop.f32.mrf.mxu3  ;;  %v1439_v10 = vadd.f32 %v1438_v24, %v3299_v3  ;;  %v3304_v24 = vld [vmem:[#allocation22_spill] sm:$0xff] }
 0x3aa   : > { %v1528_v14 = vadd.f32 %v1527_v62, %v3299_v3 }
 0x3ab   : > { %v1596_v45 = vmax.f32 %v1439_v10, 0.0  ;;  %v1790_v10 = vpop.permute.xlu1 %1789 }
 0x3ac   : > { %v1597_v8 = vmax.f32 %v1528_v14, 0.0 }
 0x3ad   : > { %v1853_v25 = vmul.f32 %v1765_v15, %v1596_v45 }
 0x3ae   : > { %v1854_v42 = vmul.f32 %v1765_v15, %v1597_v8 }
 0x3b0   : > { %v1441_v32 = vpop.f32.mrf.mxu2 }
 0x3b1   : > { %v1530_v49 = vpop.f32.mrf.mxu3  ;;  %v1442_v11 = vadd.f32 %v1441_v32, %v3300_v51  ;;  %v1785_v32 = vpop.permute.xlu0 %1784 }
 0x3b2   : > { %v1531_v23 = vadd.f32 %v1530_v49, %v3300_v51  ;;  %v1929_v49 = vadd.f32 %v1928_v18, %v1852_v57 }
 0x3b3   : > { %v1598_v43 = vmax.f32 %v1442_v11, 0.0  ;;  %v1805_v18 = vpop.permute.xlu1 %1804 }
 0x3b4   : > { %v1599_v47 = vmax.f32 %v1531_v23, 0.0  ;;  %v1930_v44 = vadd.f32 %v1929_v49, %v1854_v42 }
 0x3b5   : > { %v1855_v7 = vmul.f32 %v1770_v19, %v1598_v43 }
 0x3b8   : > { %v1443_v16 = vpop.f32.mrf.mxu2 }
 0x3b9   : > { %v1532_v17 = vpop.f32.mrf.mxu3  ;;  %v1444_v26 = vadd.f32 %v1443_v16, %v3301_v33  ;;  %v1856_v16 = vmul.f32 %v1770_v19, %v1599_v47  ;;  %v1800_v43 = vpop.permute.xlu0 %1799  ;;  %v3307_v47 = vld [vmem:[#allocation25_spill] sm:$0xff] }
 0x3ba   : > { %v1533_v39 = vadd.f32 %v1532_v17, %v3301_v33 }
 0x3bb   : > { %v1600_v2 = vmax.f32 %v1444_v26, 0.0  ;;  %v1931_v19 = vadd.f32 %v1930_v44, %v1856_v16 }
 0x3bc   : > { %v1601_v29 = vmax.f32 %v1533_v39, 0.0 }
 0x3be   : > { %v1858_v34 = vmul.f32 %v1775_v30, %v1601_v29 }
 0x3c0   : > { %v1446_v63 = vpop.f32.mrf.mxu2  ;;  %v1932_v6 = vadd.f32 %v1931_v19, %v1858_v34 }
 0x3c1   : > { %v1535_v40 = vpop.f32.mrf.mxu3  ;;  %v1447_v12 = vadd.f32 %v1446_v63, %v3302_v38  ;;  %v1893_v63 = vadd.f32 %v1892_v1, %v1853_v25 }
 0x3c2   : > { %v1536_v9 = vadd.f32 %v1535_v40, %v3302_v38  ;;  %v1857_v40 = vmul.f32 %v1775_v30, %v1600_v2  ;;  %v1795_v30 = vpop.permute.xlu2 %1794 }
 0x3c3   : > { %v1602_v55 = vmax.f32 %v1447_v12, 0.0  ;;  %v1894_v36 = vadd.f32 %v1893_v63, %v1855_v7 }
 0x3c4   : > { %v1603_v17 = vmax.f32 %v1536_v9, 0.0 }
 0x3c5   : > { %v1859_v15 = vmul.f32 %v1780_v31, %v1602_v55  ;;  %v1895_v59 = vadd.f32 %v1894_v36, %v1857_v40 }
 0x3c7   : > { %v1896_v45 = vadd.f32 %v1895_v59, %v1859_v15  ;;  %v1973_v59 = vlaneseq }
 0x3c8   : > { %v1448_v27 = vpop.f32.mrf.mxu2 }
 0x3c9   : > { %v1537_v56 = vpop.f32.mrf.mxu3  ;;  %v1449_v54 = vadd.f32 %v1448_v27, %v3303_v21  ;;  %vm1975_vm5 = vcmp.lt.s32.totalorder %v1973_v59, 256 }
 0x3ca   : > { %v1538_v52 = vadd.f32 %v1537_v56, %v3303_v21 }
 0x3cb   : > { %v1604_v27 = vmax.f32 %v1449_v54, 0.0 }
 0x3cc   : > { %v1605_v60 = vmax.f32 %v1538_v52, 0.0 }
 0x3cd   : > { %v1861_v51 = vmul.f32 %v1785_v32, %v1604_v27  ;;  %v1948_v27 = vpop.permute.xlu2 %1947 }
 0x3ce   : > { %v1862_v4 = vmul.f32 %v1785_v32, %v1605_v60  ;;  %v1950_v34 = vperm.slane %v1948_v27, 0 }
 0x3cf   : > { %v1897_v53 = vadd.f32 %v1896_v45, %v1861_v51 }
 0x3d0   : > { %v1451_v22 = vpop.f32.mrf.mxu2 }
 0x3d1   : > { %v1540_v50 = vpop.f32.mrf.mxu3  ;;  %v1452_v62 = vadd.f32 %v1451_v22, %v3304_v24 }
 0x3d2   : > { %v1541_v37 = vadd.f32 %v1540_v50, %v3304_v24  ;;  %v1860_v50 = vmul.f32 %v1780_v31, %v1603_v17 }
 0x3d3   : > { %v1606_v22 = vmax.f32 %v1452_v62, 0.0 }
 0x3d4   : > { %v1607_v14 = vmax.f32 %v1541_v37, 0.0  ;;  %v1933_v8 = vadd.f32 %v1932_v6, %v1860_v50 }
 0x3d5   : > { %v1863_v33 = vmul.f32 %v1790_v10, %v1606_v22 }
 0x3d6   : > { %v1864_v39 = vmul.f32 %v1790_v10, %v1607_v14  ;;  %v1934_v38 = vadd.f32 %v1933_v8, %v1862_v4  ;;  %v1964_v14 = vstv %s1963_s21 }
 0x3d7   : > { %v1898_v46 = vadd.f32 %v1897_v53, %v1863_v33 }
 0x3d8   : > { %v1453_v35 = vpop.f32.mrf.mxu2  ;;  %v1935_v25 = vadd.f32 %v1934_v38, %v1864_v39 }
 0x3d9   : > { %v1542_v58 = vpop.f32.mrf.mxu3  ;;  %v1454_v5 = vadd.f32 %v1453_v35, %v3305_v28 }
 0x3da   : > { %v1543_v56 = vadd.f32 %v1542_v58, %v3305_v28 }
 0x3db   : > { %v1608_v11 = vmax.f32 %v1454_v5, 0.0 }
 0x3dc   : > { %v1609_v23 = vmax.f32 %v1543_v56, 0.0 }
 0x3dd   : > { %v1865_v20 = vmul.f32 %v1795_v30, %v1608_v11 }
 0x3de   : > { %v1866_v12 = vmul.f32 %v1795_v30, %v1609_v23 }
 0x3df   : > { %v1899_v54 = vadd.f32 %v1898_v46, %v1865_v20 }
 0x3e0   : > { %v1456_v13 = vpop.f32.mrf.mxu2  ;;  %v1936_v42 = vadd.f32 %v1935_v25, %v1866_v12 }
 0x3e1   : > { %v1457_v41 = vadd.f32 %v1456_v13, %v3306_v48  ;;  %v1545_v3 = vpop.f32.mrf.mxu3 }
 0x3e2   : > { %v1546_v0 = vadd.f32 %v1545_v3, %v3306_v48 }
 0x3e3   : > { %v1610_v26 = vmax.f32 %v1457_v41, 0.0 }
 0x3e4   : > { %v1611_v35 = vmax.f32 %v1546_v0, 0.0 }
 0x3e5   : > { %v1867_v57 = vmul.f32 %v1800_v43, %v1610_v26 }
 0x3e6   : > { %v1868_v2 = vmul.f32 %v1800_v43, %v1611_v35 }
 0x3e7   : > { %v1900_v52 = vadd.f32 %v1899_v54, %v1867_v57 }
 0x3e8   : > { %v1458_v58 = vpop.f32.mrf.mxu2  ;;  %v1937_v7 = vadd.f32 %v1936_v42, %v1868_v2 }
 0x3e9   : > { %v1459_v9 = vadd.f32 %v1458_v58, %v3307_v47  ;;  %v1547_v61 = vpop.f32.mrf.mxu3 }
 0x3ea   : > { %v1548_v21 = vadd.f32 %v1547_v61, %v3307_v47 }
 0x3eb   : > { %v1612_v31 = vmax.f32 %v1459_v9, 0.0 }
 0x3ec   : > { %v1613_v29 = vmax.f32 %v1548_v21, 0.0 }
 0x3ed   : > { %v1869_v1 = vmul.f32 %v1805_v18, %v1612_v31 }
 0x3ee   : > { %v1870_v55 = vmul.f32 %v1805_v18, %v1613_v29 }
 0x3ef   : > { %v1901_v24 = vadd.f32 %v1900_v52, %v1869_v1 }
 0x3f0   : > { %v1938_v62 = vadd.f32 %v1937_v7, %v1870_v55 }
 0x3f1   : > { %v1902_v32 = vrot.slane %v1901_v24, 4 }
 0x3f2   : > { %v1939_v49 = vrot.slane %v1938_v62, 4 }
 0x3f3   : > { %v1903_v16 = vadd.f32 %v1902_v32, %v1901_v24 }
 0x3f4   : > { %v1940_v17 = vadd.f32 %v1939_v49, %v1938_v62 }
 0x3f5   : > { %v1904_v37 = vrot.slane %v1903_v16, 2 }
 0x3f6   : > { %v1941_v63 = vrot.slane %v1940_v17, 2 }
 0x3f7   : > { %v1905_v40 = vadd.f32 %v1904_v37, %v1903_v16 }
 0x3f8   : > { %v1942_v28 = vadd.f32 %v1941_v63, %v1940_v17 }
 0x3f9   : > { %v1906_v5 = vrot.slane %v1905_v40, 1 }
 0x3fa   : > { %v1943_v44 = vrot.slane %v1942_v28, 1 }
 0x3fb   : > { %v1907_v60 = vadd.f32 %v1906_v5, %v1905_v40 }
 0x3fc   : > { %v1944_v56 = vadd.f32 %v1943_v44, %v1942_v28 }
 0x3fd   : > { %v1951_v13 = vadd.f32 %v1950_v34, %v1907_v60 }
 0x3fe   : > { %v1952_v36 = vadd.f32 %v1950_v34, %v1944_v56 }
 0x3ff   : > { %v1953_v15 = vsub.f32 0.0, %v1951_v13 }
 0x400   : > { %v1954_v22 = vsub.f32 0.0, %v1952_v36 }
 0x401   : > { %v1955_v48 = vmul.f32 1.442695, %v1953_v15 }
 0x402   : > { %v1957_v41 = vmul.f32 1.442695, %v1954_v22 }
 0x403   : > { %2337 = vpow2.f32 %v1955_v48 }
 0x404   : > { %2339 = vpow2.f32 %v1957_v41 }
 0x409   : > { %v2338_v3 = vpop.eup %2337 }
 0x40a   : > { %v2340_v10 = vpop.eup %2339  ;;  %v1959_v19 = vadd.f32 1.0, %v2338_v3 }
 0x40b   : > { %v1960_v50 = vadd.f32 1.0, %v2340_v10 }
 0x40c   : > { %2341 = vrcp.f32 %v1959_v19 }
 0x40d   : > { %2343 = vrcp.f32 %v1960_v50 }
 0x412   : > { %v2342_v0 = vpop.eup %2341 }
 0x413   : > { %v2344_v51 = vpop.eup %2343  ;;  %v1965_v6 = vmul.f32 %v2342_v0, %v1964_v14 }
 0x414   : > { %v1966_v11 = vmul.f32 %v2344_v51, %v1964_v14 }
 0x416   : > { %v1969_v4 = vrot.slane %v1966_v11, 7 }
 0x418   : > { %v1971_v23 = vsel %vm1970_vm4, %v1965_v6, %v1969_v4 }
 0x419   : > { %1977 = vst.msk [vmem:[%s434_s13] sm:$0x3] %vm1975_vm5, %v1971_v23 }
 0x41a   : > { %2372 = shalt.err (!%p2369_p5)
}
 0x41b   : > { %2278 = dma.vmem_to_hbm [thread:$0]  (%p2537_p4), %s1994_s18, 32, %s1996_s14, %s1979_s28  }
 0x41c PF: > { %p2284_p6 = scmp.ge.s32.totalorder %s2423_s30, 2  ;;  %s2007_s22 = sand.u32 1, %s2403_s25  }
 0x41d   : > { %s2008_s11 = scalar_lea.sflag [#allocation5], %s2007_s22 }
 0x41e   : > { %p2281_p7 = pnand %p2284_p6, %p2544_p8 }
 0x420   : > { %p2282_p9 = pneg %p2281_p7 }
 0x422   : > { %2398 = dma.done.wait (%p2282_p9), %s2008_s11, 32  }
 0x423   : > { %2400 = vsyncadd (%p2282_p9), %s2008_s11, 4294967264  ;;  %s28_s30 = sadd.s32 1, %s2423_s30   ;;  %s3308_s29 = sld [smem:[#allocation9_spill]] }
 0x424   : > { %p25_p10 = scmp.ge.s32.totalorder %s28_s30, 4   ;;  %s3309_s28 = sld [smem:[#allocation7_spill]] }
 0x425   : > { %s3310_s15 = sld [smem:[#allocation8_spill]]  ;;  %s3311_s25 = smov %s2407_s26 }
 0x426   : > { %s3312_s26 = smov %s2411_s27 }
 0x427   :  { %27 = sbr.rel (!%p25_p10) target bundleno = 7 (0x7), region = 103 }
 0x429   : > { %s3313_s27 = smov %s3308_s29 }
 0x42b   : > { %s3314_s29 = smov %s3310_s15 }
 0x42c   :  { %2014 = vsyncpa [#allocation5], 1 }
 0x42d   :  { %2016 = vsyncpa [#allocation5 + $0x1], 1 }

</bundles_post_ra>
